<compile_context>
chip_gen: v6e
topology: v6e:2x2x1
jax: 0.10.0
libtpu: 0.0.40
codegen_flags: <defaults>
</compile_context>

<pallas_src>
import functools
from typing import NamedTuple

import jax
import jax.numpy as jnp
from jax.experimental import pallas as pl
from jax.experimental.pallas import tpu as pltpu

HIDDEN1_UNITS = 256
HIDDEN2_UNITS = 512


def _round_up(x, m):
    return ((x + m - 1) // m) * m


# --------------------------------------------------------------------------- #
# Kernel
# --------------------------------------------------------------------------- #
def critic_kernel(s_ref, a_ref,
                  w1_ref, b1_ref,
                  wa_ref,
                  wh1_ref, bh_ref,
                  wh3_ref, bh3_ref,
                  wv_ref, bv_ref,
                  out_ref):
    # Activations cast to bf16 right before each MXU dot; accumulation and all
    # elementwise work (relu, bias adds) stay in f32 (v5e VPU has no bf16).
    s = s_ref[...].astype(jnp.bfloat16)
    a = a_ref[...].astype(jnp.bfloat16)

    # x1 = relu(s @ W1 + b1)
    x1 = jnp.dot(s, w1_ref[...], preferred_element_type=jnp.float32) + b1_ref[...]
    x1 = jnp.maximum(x1, 0.0)

    # h2 = x1 @ Wh1 + a @ Wa + (bh1 + ba)   (a1 branch folded in)
    h2 = (jnp.dot(x1.astype(jnp.bfloat16), wh1_ref[...],
                  preferred_element_type=jnp.float32)
          + jnp.dot(a, wa_ref[...], preferred_element_type=jnp.float32)
          + bh_ref[...])

    # h3 = relu(h2 @ Wh3 + bh3)
    h3 = jnp.dot(h2.astype(jnp.bfloat16), wh3_ref[...],
                 preferred_element_type=jnp.float32) + bh3_ref[...]
    h3 = jnp.maximum(h3, 0.0)

    # out = h3 @ Wv_pad + bv_pad   (lane-dense: Wv padded to 128 output lanes)
    out = jnp.dot(h3.astype(jnp.bfloat16), wv_ref[...],
                  preferred_element_type=jnp.float32) + bv_ref[...]
    out_ref[...] = out.astype(out_ref.dtype)


# --------------------------------------------------------------------------- #
# Parameter handling
# --------------------------------------------------------------------------- #
def init_linear(key, in_features, out_features, dtype=jnp.float32):
    """PyTorch-style nn.Linear init: U(-1/sqrt(fan_in), 1/sqrt(fan_in)).
    Returns weight as [in, out] (pre-transposed) and bias as [1, out]."""
    kw, kb = jax.random.split(key)
    bound = 1.0 / (in_features ** 0.5)
    w = jax.random.uniform(kw, (in_features, out_features), dtype, -bound, bound)
    b = jax.random.uniform(kb, (1, out_features), dtype, -bound, bound)
    return w, b


class PreparedParams(NamedTuple):
    """Kernel-ready weights. Built once by prepare_critic_params()."""
    w1: jax.Array    # [state, 256]  bf16
    b1: jax.Array    # [1, 256]      f32
    wa: jax.Array    # [action, 512] bf16
    wh1: jax.Array   # [256, 512]    bf16
    bh: jax.Array    # [1, 512]      f32   (bh1 + ba folded)
    wh3: jax.Array   # [512, 512]    bf16
    bh3: jax.Array   # [1, 512]      f32
    wv: jax.Array    # [512, out_pad] bf16 (zero-padded columns)
    bv: jax.Array    # [1, out_pad]   f32  (zero-padded columns)


def prepare_critic_params(params):
    """One-time weight prep (NOT in the per-call path): bf16 casts, lane-dense
    padding of the V head to a 128-multiple, and a1-bias fold into the h1 bias.
    Returns (PreparedParams, out_features)."""
    (w1, b1), (wa, ba), (wh1, bh1), (wh3, bh3), (wv, bv) = params
    out_features = wv.shape[1]
    out_pad = _round_up(out_features, 128)

    wv_p = jnp.zeros((wv.shape[0], out_pad), jnp.float32).at[:, :out_features].set(
        wv.astype(jnp.float32))
    bv_p = jnp.zeros((1, out_pad), jnp.float32).at[:, :out_features].set(
        bv.astype(jnp.float32))

    prepared = PreparedParams(
        w1=w1.astype(jnp.bfloat16),
        b1=b1.astype(jnp.float32),
        wa=wa.astype(jnp.bfloat16),
        wh1=wh1.astype(jnp.bfloat16),
        bh=(bh1.astype(jnp.float32) + ba.astype(jnp.float32)),
        wh3=wh3.astype(jnp.bfloat16),
        bh3=bh3.astype(jnp.float32),
        wv=wv_p.astype(jnp.bfloat16),
        bv=bv_p,
    )
    # Materialize now so nothing leaks into the per-call jit.
    prepared = jax.tree_util.tree_map(jax.block_until_ready, prepared)
    return prepared, out_features


# --------------------------------------------------------------------------- #
# Forward wrapper
# --------------------------------------------------------------------------- #
def _choose_batch_tile(B, block_b):
    """Batch tile selection.
      * B <= 256: one 8-aligned tile covering the whole batch.
      * B  > 256: 256-multiple tiles (MXU M-dim), capped at block_b and at
        ~half the batch so the grid has >= 2 parallel steps (v7x megacore can
        then shard the batch axis across both TensorCores)."""
    if B <= 256:
        return min(_round_up(B, 8), max(8, _round_up(block_b, 8)))
    blk = max(256, (block_b // 256) * 256)
    half = _round_up((B + 1) // 2, 256)
    return min(blk, half)


@functools.partial(jax.jit, static_argnames=("out_features", "block_b", "out_dtype"))
def critic_forward(s, a, prepared: PreparedParams, out_features,
                   *, block_b=512, out_dtype=jnp.float32):
    B, state_size = s.shape
    action_size = a.shape[1]
    out_pad = prepared.wv.shape[1]

    # --- batch tiling ---
    tb = _choose_batch_tile(B, block_b)
    b_padded = _round_up(B, tb)
    if b_padded != B:
        s = jnp.pad(s, ((0, b_padded - B), (0, 0)))
        a = jnp.pad(a, ((0, b_padded - B), (0, 0)))
    grid = (b_padded // tb,)

    def resident(arr):
        # Full-array block with constant index map -> stays VMEM-resident
        # across grid steps (weights are DMA'd once per call).
        return pl.BlockSpec(arr.shape, lambda i: (0, 0))

    # --- cost estimate (advisory, lets XLA schedule around the custom call) ---
    flops = 2 * b_padded * (state_size * HIDDEN1_UNITS
                            + action_size * HIDDEN2_UNITS
                            + HIDDEN1_UNITS * HIDDEN2_UNITS
                            + HIDDEN2_UNITS * HIDDEN2_UNITS
                            + HIDDEN2_UNITS * out_pad)
    weight_bytes = sum(int(x.size) * jnp.dtype(x.dtype).itemsize for x in prepared)
    bytes_accessed = (weight_bytes
                      + b_padded * (state_size + action_size) * 4
                      + b_padded * out_pad * jnp.dtype(out_dtype).itemsize)
    cost = pl.CostEstimate(flops=flops, transcendentals=0,
                           bytes_accessed=bytes_accessed)

    # v5e scoped-VMEM default is 16 MiB; only bump it for large tiles, and keep
    # the cap under v7x's 64 MiB physical VMEM.
    vmem_limit = (48 * 1024 * 1024) if tb > 512 else None

    out = pl.pallas_call(
        critic_kernel,
        out_shape=jax.ShapeDtypeStruct((b_padded, out_pad), out_dtype),
        grid=grid,
        in_specs=[
            pl.BlockSpec((tb, state_size), lambda i: (i, 0)),      # s tile
            pl.BlockSpec((tb, action_size), lambda i: (i, 0)),     # a tile
            resident(prepared.w1), resident(prepared.b1),          # W1, b1
            resident(prepared.wa),                                 # Wa
            resident(prepared.wh1), resident(prepared.bh),         # Wh1, bh1+ba
            resident(prepared.wh3), resident(prepared.bh3),        # Wh3, bh3
            resident(prepared.wv), resident(prepared.bv),          # Wv, bv
        ],
        out_specs=pl.BlockSpec((tb, out_pad), lambda i: (i, 0)),
        compiler_params=pltpu.CompilerParams(
            dimension_semantics=("parallel",),
            vmem_limit_bytes=vmem_limit,
        ),
        cost_estimate=cost,
    )(s, a,
      prepared.w1, prepared.b1,
      prepared.wa,
      prepared.wh1, prepared.bh,
      prepared.wh3, prepared.bh3,
      prepared.wv, prepared.bv)

    # Slice off batch padding and the zero output lanes. For maximum throughput
    # a consumer can take the padded array directly (or fuse downstream ops).
    return out[:B, :out_features]


def critic_forward_ref(s, a, params):
    """Pure-JAX reference mimicking the kernel numerics (bf16 MXU inputs,
    f32 accumulation, folded bias)."""
    (w1, b1), (wa, ba), (wh1, bh1), (wh3, bh3), (wv, bv) = params
    bf16 = jnp.bfloat16

    def mm(x, w):
        return jnp.dot(x.astype(bf16), w.astype(bf16),
                       preferred_element_type=jnp.float32)

    x1 = jnp.maximum(mm(s, w1) + b1, 0.0)
    h2 = mm(x1, wh1) + mm(a, wa) + (bh1 + ba)
    h3 = jnp.maximum(mm(h2, wh3) + bh3, 0.0)
    return mm(h3, wv) + bv


# --------------------------------------------------------------------------- #
# Self-test
# --------------------------------------------------------------------------- #
if __name__ == "__main__":
    key = jax.random.PRNGKey(0)
    k_s, k_a, k1, k2, k3, k4, k5 = jax.random.split(key, 7)

    state_size = 16
    action_size = 8

    params = (
        init_linear(k1, state_size, HIDDEN1_UNITS),     # self.w1
        init_linear(k2, action_size, HIDDEN2_UNITS),    # self.a1
        init_linear(k3, HIDDEN1_UNITS, HIDDEN2_UNITS),  # self.h1
        init_linear(k4, HIDDEN2_UNITS, HIDDEN2_UNITS),  # self.h3
        init_linear(k5, HIDDEN2_UNITS, action_size),    # self.V
    )

    # One-time weight prep (out of the per-call path).
    prepared, out_features = prepare_critic_params(params)

    # Small batch (single grid step).
    batch = 8
    s = jax.random.normal(k_s, (batch, state_size), jnp.float32)
    a = jax.random.normal(k_a, (batch, action_size), jnp.float32)

    out = jax.block_until_ready(critic_forward(s, a, prepared, out_features))
    ref = critic_forward_ref(s, a, params)
    assert out.shape == (batch, action_size)
    assert jnp.allclose(out, ref, atol=5e-3, rtol=5e-3), "mismatch (small batch)"

    # Larger, non-aligned batch (exercises batch tiling + padding path).
    batch2 = 200
    s2 = jax.random.normal(k_s, (batch2, state_size), jnp.float32)
    a2 = jax.random.normal(k_a, (batch2, action_size), jnp.float32)

    out2 = jax.block_until_ready(critic_forward(s2, a2, prepared, out_features))
    ref2 = critic_forward_ref(s2, a2, params)
    assert out2.shape == (batch2, action_size)
    assert jnp.allclose(out2, ref2, atol=5e-3, rtol=5e-3), "mismatch (tiled batch)"

    # Optional reduced-writeback path (bf16 output halves the padded stream).
    out3 = jax.block_until_ready(
        critic_forward(s2, a2, prepared, out_features, out_dtype=jnp.bfloat16))
    assert out3.shape == (batch2, action_size)
    assert jnp.allclose(out3.astype(jnp.float32), ref2, atol=2e-2, rtol=2e-2), \
        "mismatch (bf16 output)"

    print("KERNEL_OK")
</pallas_src>

<mosaic_0001>
module attributes {stable_mosaic.version = 11 : i64} {
  func.func @critic_kernel(%arg0: i32, %arg1: memref<8x16xf32, #tpu.memory_space<vmem>>, %arg2: memref<8x8xf32, #tpu.memory_space<vmem>>, %arg3: memref<16x256xbf16, #tpu.memory_space<vmem>>, %arg4: memref<1x256xf32, #tpu.memory_space<vmem>>, %arg5: memref<8x512xbf16, #tpu.memory_space<vmem>>, %arg6: memref<256x512xbf16, #tpu.memory_space<vmem>>, %arg7: memref<1x512xf32, #tpu.memory_space<vmem>>, %arg8: memref<512x512xbf16, #tpu.memory_space<vmem>>, %arg9: memref<1x512xf32, #tpu.memory_space<vmem>>, %arg10: memref<512x128xbf16, #tpu.memory_space<vmem>>, %arg11: memref<1x128xf32, #tpu.memory_space<vmem>>, %arg12: memref<8x128xf32, #tpu.memory_space<vmem>>) attributes {dimension_semantics = [#tpu.dimension_semantics<parallel>], iteration_bounds = array<i64: 1>, scalar_prefetch = 0 : i64, scratch_operands = 0 : i64, tpu.core_type = #tpu.core_type<tc>, window_params = [{transform_indices = @transform_0, window_bounds = array<i64: 8, 16>}, {transform_indices = @transform_1, window_bounds = array<i64: 8, 8>}, {pipeline_mode = #tpu.pipeline_mode<synchronous>, transform_indices = @transform_2, window_bounds = array<i64: 16, 256>}, {pipeline_mode = #tpu.pipeline_mode<synchronous>, transform_indices = @transform_3, window_bounds = array<i64: 1, 256>}, {pipeline_mode = #tpu.pipeline_mode<synchronous>, transform_indices = @transform_4, window_bounds = array<i64: 8, 512>}, {pipeline_mode = #tpu.pipeline_mode<synchronous>, transform_indices = @transform_5, window_bounds = array<i64: 256, 512>}, {pipeline_mode = #tpu.pipeline_mode<synchronous>, transform_indices = @transform_6, window_bounds = array<i64: 1, 512>}, {pipeline_mode = #tpu.pipeline_mode<synchronous>, transform_indices = @transform_7, window_bounds = array<i64: 512, 512>}, {pipeline_mode = #tpu.pipeline_mode<synchronous>, transform_indices = @transform_8, window_bounds = array<i64: 1, 512>}, {pipeline_mode = #tpu.pipeline_mode<synchronous>, transform_indices = @transform_9, window_bounds = array<i64: 512, 128>}, {pipeline_mode = #tpu.pipeline_mode<synchronous>, transform_indices = @transform_10, window_bounds = array<i64: 1, 128>}, {transform_indices = @transform_11, window_bounds = array<i64: 8, 128>}]} {
    %c0 = arith.constant 0 : index
    %c0_0 = arith.constant 0 : index
    %0 = vector.load %arg1[%c0, %c0_0] : memref<8x16xf32, #tpu.memory_space<vmem>>, vector<8x16xf32>
    %1 = arith.truncf %0 : vector<8x16xf32> to vector<8x16xbf16>
    %c0_1 = arith.constant 0 : index
    %c0_2 = arith.constant 0 : index
    %2 = vector.load %arg2[%c0_1, %c0_2] : memref<8x8xf32, #tpu.memory_space<vmem>>, vector<8x8xf32>
    %3 = arith.truncf %2 : vector<8x8xf32> to vector<8x8xbf16>
    %c0_3 = arith.constant 0 : index
    %c0_4 = arith.constant 0 : index
    %4 = vector.load %arg3[%c0_3, %c0_4] : memref<16x256xbf16, #tpu.memory_space<vmem>>, vector<16x256xbf16>
    %cst = arith.constant dense<0.000000e+00> : vector<8x256xf32>
    %5 = tpu.matmul %1, %4, %cst {dimension_numbers = #tpu.dot_dimension_numbers<[1], [0], [0], [1], [0, 0, 1, 1], [], []>} : vector<8x16xbf16>, vector<16x256xbf16>, vector<8x256xf32> -> vector<8x256xf32>
    %c0_5 = arith.constant 0 : index
    %c0_6 = arith.constant 0 : index
    %6 = vector.load %arg4[%c0_5, %c0_6] : memref<1x256xf32, #tpu.memory_space<vmem>>, vector<1x256xf32>
    %7 = vector.broadcast %6 : vector<1x256xf32> to vector<8x256xf32>
    %8 = arith.addf %5, %7 : vector<8x256xf32>
    %cst_7 = arith.constant 0.000000e+00 : f32
    %9 = vector.broadcast %cst_7 : f32 to vector<8x256xf32>
    %10 = arith.maximumf %8, %9 : vector<8x256xf32>
    %11 = arith.truncf %10 : vector<8x256xf32> to vector<8x256xbf16>
    %c0_8 = arith.constant 0 : index
    %c0_9 = arith.constant 0 : index
    %12 = vector.load %arg6[%c0_8, %c0_9] : memref<256x512xbf16, #tpu.memory_space<vmem>>, vector<256x512xbf16>
    %cst_10 = arith.constant dense<0.000000e+00> : vector<8x512xf32>
    %13 = tpu.matmul %11, %12, %cst_10 {dimension_numbers = #tpu.dot_dimension_numbers<[1], [0], [0], [1], [0, 0, 1, 1], [], []>} : vector<8x256xbf16>, vector<256x512xbf16>, vector<8x512xf32> -> vector<8x512xf32>
    %c0_11 = arith.constant 0 : index
    %c0_12 = arith.constant 0 : index
    %14 = vector.load %arg5[%c0_11, %c0_12] : memref<8x512xbf16, #tpu.memory_space<vmem>>, vector<8x512xbf16>
    %cst_13 = arith.constant dense<0.000000e+00> : vector<8x512xf32>
    %15 = tpu.matmul %3, %14, %cst_13 {dimension_numbers = #tpu.dot_dimension_numbers<[1], [0], [0], [1], [0, 0, 1, 1], [], []>} : vector<8x8xbf16>, vector<8x512xbf16>, vector<8x512xf32> -> vector<8x512xf32>
    %16 = arith.addf %13, %15 : vector<8x512xf32>
    %c0_14 = arith.constant 0 : index
    %c0_15 = arith.constant 0 : index
    %17 = vector.load %arg7[%c0_14, %c0_15] : memref<1x512xf32, #tpu.memory_space<vmem>>, vector<1x512xf32>
    %18 = vector.broadcast %17 : vector<1x512xf32> to vector<8x512xf32>
    %19 = arith.addf %16, %18 : vector<8x512xf32>
    %20 = arith.truncf %19 : vector<8x512xf32> to vector<8x512xbf16>
    %c0_16 = arith.constant 0 : index
    %c0_17 = arith.constant 0 : index
    %21 = vector.load %arg8[%c0_16, %c0_17] : memref<512x512xbf16, #tpu.memory_space<vmem>>, vector<512x512xbf16>
    %cst_18 = arith.constant dense<0.000000e+00> : vector<8x512xf32>
    %22 = tpu.matmul %20, %21, %cst_18 {dimension_numbers = #tpu.dot_dimension_numbers<[1], [0], [0], [1], [0, 0, 1, 1], [], []>} : vector<8x512xbf16>, vector<512x512xbf16>, vector<8x512xf32> -> vector<8x512xf32>
    %c0_19 = arith.constant 0 : index
    %c0_20 = arith.constant 0 : index
    %23 = vector.load %arg9[%c0_19, %c0_20] : memref<1x512xf32, #tpu.memory_space<vmem>>, vector<1x512xf32>
    %24 = vector.broadcast %23 : vector<1x512xf32> to vector<8x512xf32>
    %25 = arith.addf %22, %24 : vector<8x512xf32>
    %cst_21 = arith.constant 0.000000e+00 : f32
    %26 = vector.broadcast %cst_21 : f32 to vector<8x512xf32>
    %27 = arith.maximumf %25, %26 : vector<8x512xf32>
    %28 = arith.truncf %27 : vector<8x512xf32> to vector<8x512xbf16>
    %c0_22 = arith.constant 0 : index
    %c0_23 = arith.constant 0 : index
    %29 = vector.load %arg10[%c0_22, %c0_23] : memref<512x128xbf16, #tpu.memory_space<vmem>>, vector<512x128xbf16>
    %cst_24 = arith.constant dense<0.000000e+00> : vector<8x128xf32>
    %30 = tpu.matmul %28, %29, %cst_24 {dimension_numbers = #tpu.dot_dimension_numbers<[1], [0], [0], [1], [0, 0, 1, 1], [], []>} : vector<8x512xbf16>, vector<512x128xbf16>, vector<8x128xf32> -> vector<8x128xf32>
    %c0_25 = arith.constant 0 : index
    %c0_26 = arith.constant 0 : index
    %31 = vector.load %arg11[%c0_25, %c0_26] : memref<1x128xf32, #tpu.memory_space<vmem>>, vector<1x128xf32>
    %32 = vector.broadcast %31 : vector<1x128xf32> to vector<8x128xf32>
    %33 = arith.addf %30, %32 : vector<8x128xf32>
    %c0_27 = arith.constant 0 : index
    %c0_28 = arith.constant 0 : index
    %34 = vector.load %arg12[%c0_27, %c0_28] : memref<8x128xf32, #tpu.memory_space<vmem>>, vector<8x128xf32>
    tpu.vector_store %arg12[%c0_27, %c0_28], %33 {strides = array<i32>} : memref<8x128xf32, #tpu.memory_space<vmem>>, vector<8x128xf32>,
    return
  }
  func.func @transform_0(%arg0: i32) -> (i32, i32) {
    %c0_i32 = arith.constant 0 : i32
    %c0_i32_0 = arith.constant 0 : i32
    return %arg0, %c0_i32 : i32, i32
  }
  func.func @transform_1(%arg0: i32) -> (i32, i32) {
    %c0_i32 = arith.constant 0 : i32
    %c0_i32_0 = arith.constant 0 : i32
    return %arg0, %c0_i32 : i32, i32
  }
  func.func @transform_2(%arg0: i32) -> (i32, i32) {
    %c0_i32 = arith.constant 0 : i32
    %c0_i32_0 = arith.constant 0 : i32
    %c0_i32_1 = arith.constant 0 : i32
    return %c0_i32, %c0_i32_0 : i32, i32
  }
  func.func @transform_3(%arg0: i32) -> (i32, i32) {
    %c0_i32 = arith.constant 0 : i32
    %c0_i32_0 = arith.constant 0 : i32
    %c0_i32_1 = arith.constant 0 : i32
    return %c0_i32, %c0_i32_0 : i32, i32
  }
  func.func @transform_4(%arg0: i32) -> (i32, i32) {
    %c0_i32 = arith.constant 0 : i32
    %c0_i32_0 = arith.constant 0 : i32
    %c0_i32_1 = arith.constant 0 : i32
    return %c0_i32, %c0_i32_0 : i32, i32
  }
  func.func @transform_5(%arg0: i32) -> (i32, i32) {
    %c0_i32 = arith.constant 0 : i32
    %c0_i32_0 = arith.constant 0 : i32
    %c0_i32_1 = arith.constant 0 : i32
    return %c0_i32, %c0_i32_0 : i32, i32
  }
  func.func @transform_6(%arg0: i32) -> (i32, i32) {
    %c0_i32 = arith.constant 0 : i32
    %c0_i32_0 = arith.constant 0 : i32
    %c0_i32_1 = arith.constant 0 : i32
    return %c0_i32, %c0_i32_0 : i32, i32
  }
  func.func @transform_7(%arg0: i32) -> (i32, i32) {
    %c0_i32 = arith.constant 0 : i32
    %c0_i32_0 = arith.constant 0 : i32
    %c0_i32_1 = arith.constant 0 : i32
    return %c0_i32, %c0_i32_0 : i32, i32
  }
  func.func @transform_8(%arg0: i32) -> (i32, i32) {
    %c0_i32 = arith.constant 0 : i32
    %c0_i32_0 = arith.constant 0 : i32
    %c0_i32_1 = arith.constant 0 : i32
    return %c0_i32, %c0_i32_0 : i32, i32
  }
  func.func @transform_9(%arg0: i32) -> (i32, i32) {
    %c0_i32 = arith.constant 0 : i32
    %c0_i32_0 = arith.constant 0 : i32
    %c0_i32_1 = arith.constant 0 : i32
    return %c0_i32, %c0_i32_0 : i32, i32
  }
  func.func @transform_10(%arg0: i32) -> (i32, i32) {
    %c0_i32 = arith.constant 0 : i32
    %c0_i32_0 = arith.constant 0 : i32
    %c0_i32_1 = arith.constant 0 : i32
    return %c0_i32, %c0_i32_0 : i32, i32
  }
  func.func @transform_11(%arg0: i32) -> (i32, i32) {
    %c0_i32 = arith.constant 0 : i32
    %c0_i32_0 = arith.constant 0 : i32
    return %arg0, %c0_i32 : i32, i32
  }
}

</mosaic_0001>

<bundles_post_ra>
// kernel: critic_forward.1
= control target key start
LH: loop header
LB: loop body
LE: loop exit
PB: predicated region body
PF: predicated region fallthrough
CT: control target
= control target key end

     0   :  { %16 = vsyncpa [#allocation3], 0  ;;  %s3133_s0 = inlined_call_operand.hbm [shape: f32[8,16], index: 0, kind: input, shape index: {}]   ;;  %s3134_s1 = inlined_call_operand.hbm [shape: f32[8,8], index: 1, kind: input, shape index: {}]   ;;  %s3135_s2 = inlined_call_operand.hbm [shape: bf16[16,256], index: 2, kind: input, shape index: {}]   ;;  %s3136_s3 = inlined_call_operand.hbm [shape: f32[1,256], index: 3, kind: input, shape index: {}]   ;;  %s3137_s4 = inlined_call_operand.hbm [shape: bf16[8,512], index: 4, kind: input, shape index: {}]   ;;  %s3138_s5 = inlined_call_operand.hbm [shape: bf16[256,512], index: 5, kind: input, shape index: {}]   ;;  %s3139_s6 = inlined_call_operand.vmem [shape: f32[1,512], index: 6, kind: input, shape index: {}]   ;;  %s3140_s7 = inlined_call_operand.hbm [shape: bf16[512,512], index: 7, kind: input, shape index: {}]   ;;  %s3141_s8 = inlined_call_operand.vmem [shape: f32[1,512], index: 8, kind: input, shape index: {}]   ;;  %s3142_s9 = inlined_call_operand.hbm [shape: bf16[512,128], index: 9, kind: input, shape index: {}]   ;;  %s3143_s10 = inlined_call_operand.vmem [shape: f32[1,128], index: 10, kind: input, shape index: {}]   ;;  %s3144_s11 = inlined_call_operand.hbm [shape: f32[8,128], index: 11, kind: output, shape index: {}]  }
   0x1   :  { %17 = vsyncpa [#allocation6], 0 }
   0x2   :  { %18 = vsyncpa [#allocation9], 0 }
   0x3   :  { %19 = vsyncpa [#allocation12], 0 }
   0x4   :  { %20 = vsyncpa [#allocation15], 0 }
   0x5   :  { %21 = vsyncpa [#allocation4], 0  ;;  %s2965_s17 = smov [#allocation5]   ;;  %s2966_s19 = smov [#allocation8]  }
   0x6   :  { %s38_s18 = sshll.u32 %s2965_s17, 4  ;;  %s60_s20 = sshll.u32 %s2966_s19, 4  ;;  %s39_s18 = int_to_ptr.vmem [resolvable:$true] %s38_s18  ;;  %s61_s20 = int_to_ptr.vmem [resolvable:$true] %s60_s20 }
   0x7   :  { %s2781_s21 = scalar_lea.vmem %s39_s18, 128  ;;  %p2786_p1 = scmp.lt.s32.totalorder %s39_s18, %s39_s18 }
   0x8   :  { %p2782_p0 = scmp.ne.s32.totalorder %s39_s18, %s2781_s21  ;;  %p2787_p2 = scmp.lt.s32.totalorder %s2781_s21, %s2781_s21 }
   0xa   :  { %p2788_p3 = por %p2787_p2, %p2786_p1 }
   0xc   :  { %p2789_p4 = pnand %p2788_p3, %p2782_p0 }
   0xe   :  { %2792 = shalt.err (!%p2789_p4)
}
   0xf   :  { %41 = dma.hbm_to_vmem [thread:$0]  %s3134_s1, 128, %s39_s18, [#allocation6]  }
  0x10   :  { %s2801_s24 = scalar_lea.vmem %s61_s20, 32  ;;  %p2806_p6 = scmp.lt.s32.totalorder %s61_s20, %s61_s20 }
  0x11   :  { %p2802_p5 = scmp.ne.s32.totalorder %s61_s20, %s2801_s24  ;;  %p2807_p7 = scmp.lt.s32.totalorder %s2801_s24, %s2801_s24 }
  0x13   :  { %p2808_p8 = por %p2807_p7, %p2806_p6 }
  0x15   :  { %p2809_p9 = pnand %p2808_p8, %p2802_p5 }
  0x17   :  { %2812 = shalt.err (!%p2809_p9)
}
  0x18   :  { %63 = dma.hbm_to_vmem [thread:$0]  %s3136_s3, 32, %s61_s20, [#allocation9]  }
  0x19   :  { %s2967_s27 = smov [#allocation11]  }
  0x1a   :  { %s79_s28 = sshll.u32 %s2967_s27, 4  ;;  %s80_s28 = int_to_ptr.vmem [resolvable:$true] %s79_s28 }
  0x1b   :  { %s2821_s29 = scalar_lea.vmem %s80_s28, 8192  ;;  %p2826_p11 = scmp.lt.s32.totalorder %s80_s28, %s80_s28 }
  0x1c   :  { %p2822_p10 = scmp.ne.s32.totalorder %s80_s28, %s2821_s29  ;;  %p2827_p12 = scmp.lt.s32.totalorder %s2821_s29, %s2821_s29 }
  0x1e   :  { %p2828_p13 = por %p2827_p12, %p2826_p11 }
  0x20   :  { %p2829_p0 = pnand %p2828_p13, %p2822_p10 }
  0x22   :  { %2832 = shalt.err (!%p2829_p0)
}
  0x23   :  { %s2968_s1 = smov 256   ;;  %s2969_s30 = smov 16  }
  0x24   :  { %85 = dma.hbm_to_vmem [thread:$0]  %s3138_s5, 8192, %s80_s28, [#allocation12], %s2968_s1, %s2968_s1, %s2969_s30  }
  0x25   :  { %s2970_s3 = smov [#allocation2]   ;;  %s2971_s15 = smov [#allocation7]  }
  0x26   :  { %s28_s14 = sshll.u32 %s2970_s3, 4  ;;  %s47_s16 = sshll.u32 %s2971_s15, 4  ;;  %s29_s14 = int_to_ptr.vmem [resolvable:$true] %s28_s14  ;;  %s48_s16 = int_to_ptr.vmem [resolvable:$true] %s47_s16 }
  0x27   :  { %s2841_s17 = scalar_lea.vmem %s29_s14, 128  ;;  %p2846_p2 = scmp.lt.s32.totalorder %s29_s14, %s29_s14 }
  0x28   :  { %p2842_p1 = scmp.ne.s32.totalorder %s29_s14, %s2841_s17  ;;  %p2847_p3 = scmp.lt.s32.totalorder %s2841_s17, %s2841_s17 }
  0x2a   :  { %p2848_p4 = por %p2847_p3, %p2846_p2 }
  0x2c   :  { %p2849_p5 = pnand %p2848_p4, %p2842_p1 }
  0x2e   :  { %2852 = shalt.err (!%p2849_p5)
}
  0x2f   :  { %31 = dma.hbm_to_vmem [thread:$0]  %s3133_s0, 128, %s29_s14, [#allocation3]  }
  0x30   :  { %s2861_s20 = scalar_lea.vmem %s48_s16, 256  ;;  %p2866_p7 = scmp.lt.s32.totalorder %s48_s16, %s48_s16 }
  0x31   :  { %p2862_p6 = scmp.ne.s32.totalorder %s48_s16, %s2861_s20  ;;  %p2867_p8 = scmp.lt.s32.totalorder %s2861_s20, %s2861_s20 }
  0x33   :  { %p2868_p9 = por %p2867_p8, %p2866_p7 }
  0x35   :  { %p2869_p10 = pnand %p2868_p9, %p2862_p6 }
  0x37   :  { %2872 = shalt.err (!%p2869_p10)
}
  0x38   :  { %s2972_s5 = smov 128   ;;  %s2973_s21 = smov 8  }
  0x39   :  { %53 = dma.hbm_to_vmem [thread:$0]  %s3135_s2, 256, %s48_s16, [#allocation6], %s2972_s5, %s2972_s5, %s2973_s21  }
  0x3a   :  { %s2974_s24 = smov [#allocation10]   ;;  %s2975_s26 = smov [#allocation13]  }
  0x3b   :  { %s70_s25 = sshll.u32 %s2974_s24, 4  ;;  %s93_s27 = sshll.u32 %s2975_s26, 4  ;;  %s71_s25 = int_to_ptr.vmem [resolvable:$true] %s70_s25  ;;  %s94_s27 = int_to_ptr.vmem [resolvable:$true] %s93_s27 }
  0x3c   :  { %s2881_s0 = scalar_lea.vmem %s71_s25, 256  ;;  %p2886_p12 = scmp.lt.s32.totalorder %s71_s25, %s71_s25 }
  0x3d   :  { %p2882_p11 = scmp.ne.s32.totalorder %s71_s25, %s2881_s0  ;;  %p2887_p13 = scmp.lt.s32.totalorder %s2881_s0, %s2881_s0 }
  0x3f   :  { %p2888_p0 = por %p2887_p13, %p2886_p12 }
  0x41   :  { %p2889_p1 = pnand %p2888_p0, %p2882_p11 }
  0x43   :  { %2892 = shalt.err (!%p2889_p1)
}
  0x44   :  { %73 = dma.hbm_to_vmem [thread:$0]  %s3137_s4, 256, %s71_s25, [#allocation9]  }
  0x45   :  { %s2901_s12 = scalar_lea.vmem %s94_s27, 16384  ;;  %p2906_p3 = scmp.lt.s32.totalorder %s94_s27, %s94_s27 }
  0x46   :  { %p2902_p2 = scmp.ne.s32.totalorder %s94_s27, %s2901_s12  ;;  %p2907_p4 = scmp.lt.s32.totalorder %s2901_s12, %s2901_s12 }
  0x48   :  { %p2908_p5 = por %p2907_p4, %p2906_p3 }
  0x4a   :  { %p2909_p6 = pnand %p2908_p5, %p2902_p2 }
  0x4c   :  { %2912 = shalt.err (!%p2909_p6)
}
  0x4d   :  { %99 = dma.hbm_to_vmem [thread:$0]  %s3140_s7, 16384, %s94_s27, [#allocation12], %s2968_s1, %s2968_s1, %s2969_s30  }
  0x4e   :  { %s2976_s3 = smov [#allocation14]  }
  0x4f   :  { %s107_s14 = sshll.u32 %s2976_s3, 4  ;;  %s108_s14 = int_to_ptr.vmem [resolvable:$true] %s107_s14 }
  0x50   :  { %s2921_s15 = scalar_lea.vmem %s108_s14, 4096  ;;  %p2926_p8 = scmp.lt.s32.totalorder %s108_s14, %s108_s14 }
  0x51   :  { %p2922_p7 = scmp.ne.s32.totalorder %s108_s14, %s2921_s15  ;;  %p2927_p9 = scmp.lt.s32.totalorder %s2921_s15, %s2921_s15 }
  0x53   :  { %p2928_p10 = por %p2927_p9, %p2926_p8 }
  0x55   :  { %p2929_p11 = pnand %p2928_p10, %p2922_p7 }
  0x57   :  { %2932 = shalt.err (!%p2929_p11)
}
  0x58   :  { %s2977_s4 = smov 64   ;;  %s2978_s16 = smov 4  }
  0x59   :  { %113 = dma.hbm_to_vmem [thread:$0]  %s3142_s9, 4096, %s108_s14, [#allocation15], %s2977_s4, %s2977_s4, %s2978_s16  }
  0x5a   :  { %2953 = dma.done.wait [#allocation3], 128  }
  0x5b   :  { %2954 = vsyncadd [#allocation3], 4294967168 }
  0x5c   :  { %2955 = dma.done.wait [#allocation6], 384  }
  0x5d   :  { %2956 = vsyncadd [#allocation6], 4294966912 }
  0x5e   :  { %2957 = dma.done.wait [#allocation9], 288  }
  0x5f   :  { %2958 = vsyncadd [#allocation9], 4294967008 }
  0x60   :  { %2959 = dma.done.wait [#allocation12], 24576  }
  0x61   :  { %2960 = vsyncadd [#allocation12], 4294942720 }
  0x62   :  { %2961 = dma.done.wait [#allocation15], 4096  }
  0x63   :  { %2962 = vsyncadd [#allocation15], 4294963200  ;;  %v2979_v0 = vmov 0   ;;  %v2446_v1 = vld [vmem:[#allocation7 + $0x4] ss:$8 sps:$4 sm:$0xff]   ;;  %v141_v3 = vld [vmem:[#allocation2] sm:$0xff] }
  0x64   :  { %205 = vmatprep.mubr.bf16.mxu0 %v2979_v0  ;;  %343 = vmatprep.mubr.bf16.mxu1 %v2979_v0  ;;  %v2448_v2 = vld [vmem:[#allocation7] ss:$8 sps:$4 sm:$0xff]   ;;  %v282_v4 = vld [vmem:[#allocation10] sm:$0xff]  ;;  %vm298_vm0 = vcmask 1043456   ;;  %v142_v5 = vpack.c.bf16 %v141_v3, %v141_v3  ;;  %vm169_vm1 = vcmask 130048   ;;  %vm294_vm2 = vcmask 64512  }
  0x65   :  { %187 = vmatprep.subr.bf16.mxu0 %v2446_v1  ;;  %v2154_v6 = vcombine.high %v282_v4, %v282_v4  ;;  %v2153_v7 = vcombine.low %v282_v4, %v282_v4  ;;  %v283_v8 = vld [vmem:[#allocation10 + $0x8] sm:$0xff]  ;;  %v2455_v12 = vld [vmem:[#allocation11 + $0xe4] ss:$16 sps:$4 sm:$0xff]   ;;  %v2453_v15 = vld [vmem:[#allocation11 + $0xe0] ss:$16 sps:$4 sm:$0xff]   ;;  %s2980_s19 = smov [#allocation16]  }
  0x66   :  { %v143_v9 = vld [vmem:[#allocation5] sm:$0xff]  ;;  %188 = vmatpush1.bf16.msra.mxu0 %v2448_v2  ;;  %v2156_v10 = vcombine.high %v283_v8, %v283_v8  ;;  %v2155_v11 = vcombine.low %v283_v8, %v283_v8  ;;  %v2459_v19 = vld [vmem:[#allocation11 + $0xc0] ss:$16 sps:$4 sm:$0xff]   ;;  %s2137_s20 = sshll.u32 %s2980_s19, 4  ;;  %s2138_s20 = int_to_ptr.vmem [resolvable:$true] %s2137_s20 }
  0x67   :  { %2157 = vmatprep.subr.msk.bf16.mxu1 %vm298_vm0, %v2154_v6  ;;  %v300_v13 = vsel %vm298_vm0, %v2153_v7, 0  ;;  %v144_v14 = vpack.c.bf16 %v143_v9, %v143_v9  ;;  %v2458_v17 = vld [vmem:[#allocation11 + $0xec] ss:$16 sps:$4 sm:$0xff]   ;;  %v2461_v18 = vld [vmem:[#allocation11 + $0xc4] ss:$16 sps:$4 sm:$0xff]   ;;  %s2933_s5 = scalar_lea.vmem %s2138_s20, 128  ;;  %p2938_p13 = scmp.lt.s32.totalorder %s2138_s20, %s2138_s20 }
  0x68   :  { %326 = vmatpush1.bf16.msra.mxu1 %v300_v13  ;;  %2159 = vmatprep.subr.msk.bf16.mxu0 %vm298_vm0, %v2156_v10  ;;  %v306_v16 = vsel %vm298_vm0, %v2155_v11, 0  ;;  %v2467_v20 = vld [vmem:[#allocation11 + $0xa4] ss:$16 sps:$4 sm:$0xff]   ;;  %v2456_v21 = vld [vmem:[#allocation11 + $0xe8] ss:$16 sps:$4 sm:$0xff]   ;;  %p2934_p12 = scmp.ne.s32.totalorder %s2138_s20, %s2933_s5  ;;  %p2939_p0 = scmp.lt.s32.totalorder %s2933_s5, %s2933_s5 }
  0x69   :  { %2152 = vmatmul.mubr.msk.bf16.vlgmr.msra.gmra.mxu0 %vm169_vm1, %v142_v5  ;;  %713 = vmatprep.subr.bf16.mxu1 %v2455_v12  ;;  %v2464_v22 = vld [vmem:[#allocation11 + $0xcc] ss:$16 sps:$4 sm:$0xff]   ;;  %v2465_v23 = vld [vmem:[#allocation11 + $0xa0] ss:$16 sps:$4 sm:$0xff]   ;;  %v2473_v24 = vld [vmem:[#allocation11 + $0x84] ss:$16 sps:$4 sm:$0xff]  }
  0x6a   :  { %367 = vmatpush1.bf16.msra.mxu0 %v306_v16  ;;  %384 = vmatprep.mubr.bf16.mxu0 %v2979_v0  ;;  %v2462_v25 = vld [vmem:[#allocation11 + $0xc8] ss:$16 sps:$4 sm:$0xff]   ;;  %v2470_v26 = vld [vmem:[#allocation11 + $0xac] ss:$16 sps:$4 sm:$0xff]   ;;  %v2471_v27 = vld [vmem:[#allocation11 + $0x80] ss:$16 sps:$4 sm:$0xff]   ;;  %p2940_p1 = por %p2939_p0, %p2938_p13 }
  0x6b   :  { %2158 = vmatmul.mubr.msk.bf16.vlgmr.msra.gmra.mxu1 %vm294_vm2, %v144_v14  ;;  %754 = vmatprep.subr.bf16.mxu0 %v2458_v17  ;;  %v2479_v28 = vld [vmem:[#allocation11 + $0x64] ss:$16 sps:$4 sm:$0xff]   ;;  %v2468_v29 = vld [vmem:[#allocation11 + $0xa8] ss:$16 sps:$4 sm:$0xff]   ;;  %v2476_v30 = vld [vmem:[#allocation11 + $0x8c] ss:$16 sps:$4 sm:$0xff]   ;;  %v149_v17 = vlaneseq }
  0x6c   :  { %714 = vmatpush1.bf16.msra.mxu1 %v2453_v15  ;;  %v2477_v31 = vld [vmem:[#allocation11 + $0x60] ss:$16 sps:$4 sm:$0xff]   ;;  %v2485_v32 = vld [vmem:[#allocation11 + $0x44] ss:$16 sps:$4 sm:$0xff]   ;;  %v2474_v33 = vld [vmem:[#allocation11 + $0x88] ss:$16 sps:$4 sm:$0xff]   ;;  %p2941_p2 = pnand %p2940_p1, %p2934_p12 }
  0x6d   :  { %715 = vmatprep.subr.bf16.mxu1 %v2461_v18  ;;  %v2482_v34 = vld [vmem:[#allocation11 + $0x6c] ss:$16 sps:$4 sm:$0xff]   ;;  %v2483_v35 = vld [vmem:[#allocation11 + $0x40] ss:$16 sps:$4 sm:$0xff]   ;;  %v2491_v36 = vld [vmem:[#allocation11 + $0x24] ss:$16 sps:$4 sm:$0xff]  }
  0x6e   :  { %v2480_v37 = vld [vmem:[#allocation11 + $0x68] ss:$16 sps:$4 sm:$0xff]   ;;  %v2488_v38 = vld [vmem:[#allocation11 + $0x4c] ss:$16 sps:$4 sm:$0xff]   ;;  %v2489_v39 = vld [vmem:[#allocation11 + $0x20] ss:$16 sps:$4 sm:$0xff]  }
  0x6f   :  { %v2497_v40 = vld [vmem:[#allocation11 + $0x4] ss:$16 sps:$4 sm:$0xff]   ;;  %v2486_v41 = vld [vmem:[#allocation11 + $0x48] ss:$16 sps:$4 sm:$0xff]   ;;  %v2494_v42 = vld [vmem:[#allocation11 + $0x2c] ss:$16 sps:$4 sm:$0xff]  }
  0x70   :  { %716 = vmatpush1.bf16.msra.mxu1 %v2459_v19  ;;  %v2495_v43 = vld [vmem:[#allocation11] ss:$16 sps:$4 sm:$0xff]   ;;  %v2503_v44 = vld [vmem:[#allocation11 + $0x1e4] ss:$16 sps:$4 sm:$0xff]   ;;  %v2492_v45 = vld [vmem:[#allocation11 + $0x28] ss:$16 sps:$4 sm:$0xff]  }
  0x71   :  { %2160 = vmatmul.mubr.msk.bf16.vlgmr.msra.gmra.mxu0 %vm294_vm2, %v144_v14  ;;  %717 = vmatprep.subr.bf16.mxu1 %v2467_v20  ;;  %v2500_v46 = vld [vmem:[#allocation11 + $0xc] ss:$16 sps:$4 sm:$0xff]   ;;  %v2501_v47 = vld [vmem:[#allocation11 + $0x1e0] ss:$16 sps:$4 sm:$0xff]   ;;  %v2498_v48 = vld [vmem:[#allocation11 + $0x8] ss:$16 sps:$4 sm:$0xff]  }
  0x72   :  { %755 = vmatpush1.bf16.msra.mxu0 %v2456_v21  ;;  %v2509_v49 = vld [vmem:[#allocation11 + $0x1c4] ss:$16 sps:$4 sm:$0xff]   ;;  %v2506_v50 = vld [vmem:[#allocation11 + $0x1ec] ss:$16 sps:$4 sm:$0xff]   ;;  %v2507_v51 = vld [vmem:[#allocation11 + $0x1c0] ss:$16 sps:$4 sm:$0xff]  }
  0x73   :  { %756 = vmatprep.subr.bf16.mxu0 %v2464_v22  ;;  %v2515_v52 = vld [vmem:[#allocation11 + $0x1a4] ss:$16 sps:$4 sm:$0xff]   ;;  %v2504_v53 = vld [vmem:[#allocation11 + $0x1e8] ss:$16 sps:$4 sm:$0xff]   ;;  %v2512_v54 = vld [vmem:[#allocation11 + $0x1cc] ss:$16 sps:$4 sm:$0xff]  }
  0x74   :  { %718 = vmatpush1.bf16.msra.mxu1 %v2465_v23  ;;  %v2513_v55 = vld [vmem:[#allocation11 + $0x1a0] ss:$16 sps:$4 sm:$0xff]   ;;  %v2521_v56 = vld [vmem:[#allocation11 + $0x184] ss:$16 sps:$4 sm:$0xff]   ;;  %v2510_v57 = vld [vmem:[#allocation11 + $0x1c8] ss:$16 sps:$4 sm:$0xff]  }
  0x75   :  { %719 = vmatprep.subr.bf16.mxu1 %v2473_v24  ;;  %v2518_v58 = vld [vmem:[#allocation11 + $0x1ac] ss:$16 sps:$4 sm:$0xff]   ;;  %v2519_v59 = vld [vmem:[#allocation11 + $0x180] ss:$16 sps:$4 sm:$0xff]   ;;  %v2527_v60 = vld [vmem:[#allocation11 + $0x164] ss:$16 sps:$4 sm:$0xff]  }
  0x76   :  { %757 = vmatpush1.bf16.msra.mxu0 %v2462_v25  ;;  %v2516_v61 = vld [vmem:[#allocation11 + $0x1a8] ss:$16 sps:$4 sm:$0xff]   ;;  %v2524_v62 = vld [vmem:[#allocation11 + $0x18c] ss:$16 sps:$4 sm:$0xff]   ;;  %v2525_v63 = vld [vmem:[#allocation11 + $0x160] ss:$16 sps:$4 sm:$0xff]  }
  0x77   :  { %758 = vmatprep.subr.bf16.mxu0 %v2470_v26  ;;  %v2533_v0 = vld [vmem:[#allocation11 + $0x144] ss:$16 sps:$4 sm:$0xff]   ;;  %v2522_v1 = vld [vmem:[#allocation11 + $0x188] ss:$16 sps:$4 sm:$0xff]   ;;  %v2530_v2 = vld [vmem:[#allocation11 + $0x16c] ss:$16 sps:$4 sm:$0xff]  }
  0x78   :  { %720 = vmatpush1.bf16.msra.mxu1 %v2471_v27  ;;  %v2531_v3 = vld [vmem:[#allocation11 + $0x140] ss:$16 sps:$4 sm:$0xff]   ;;  %v2528_v4 = vld [vmem:[#allocation11 + $0x168] ss:$16 sps:$4 sm:$0xff]   ;;  %v2536_v5 = vld [vmem:[#allocation11 + $0x14c] ss:$16 sps:$4 sm:$0xff]  }
  0x79   :  { %721 = vmatprep.subr.bf16.mxu1 %v2479_v28  ;;  %v2534_v6 = vld [vmem:[#allocation11 + $0x148] ss:$16 sps:$4 sm:$0xff]   ;;  %v2539_v7 = vld [vmem:[#allocation11 + $0x124] ss:$16 sps:$4 sm:$0xff]   ;;  %v2542_v8 = vld [vmem:[#allocation11 + $0x12c] ss:$16 sps:$4 sm:$0xff]  }
  0x7a   :  { %759 = vmatpush1.bf16.msra.mxu0 %v2468_v29  ;;  %v2537_v9 = vld [vmem:[#allocation11 + $0x120] ss:$16 sps:$4 sm:$0xff]   ;;  %v2540_v10 = vld [vmem:[#allocation11 + $0x128] ss:$16 sps:$4 sm:$0xff]   ;;  %v2545_v11 = vld [vmem:[#allocation11 + $0x104] ss:$16 sps:$4 sm:$0xff]  }
  0x7b   :  { %760 = vmatprep.subr.bf16.mxu0 %v2476_v30  ;;  %v2548_v12 = vld [vmem:[#allocation11 + $0x10c] ss:$16 sps:$4 sm:$0xff]   ;;  %v2543_v13 = vld [vmem:[#allocation11 + $0x100] ss:$16 sps:$4 sm:$0xff]   ;;  %v2546_v14 = vld [vmem:[#allocation11 + $0x108] ss:$16 sps:$4 sm:$0xff]  }
  0x7c   :  { %722 = vmatpush1.bf16.msra.mxu1 %v2477_v31  ;;  %v2551_v15 = vld [vmem:[#allocation13 + $0xe4] ss:$16 sps:$4 sm:$0xff]   ;;  %v3077_v18 = vshrl.u32 %v149_v17, 7  ;;  %v147_v20 = vld [vmem:[#allocation8] sm:$0x3] }
  0x7d   :  { %723 = vmatprep.subr.bf16.mxu1 %v2485_v32  ;;  %v2554_v16 = vld [vmem:[#allocation13 + $0x2e4] ss:$16 sps:$4 sm:$0xff]  }
  0x7e   :  { %761 = vmatpush1.bf16.msra.mxu0 %v2474_v33  ;;  %v3080_v19 = vsub.s32 0, %v3077_v18  ;;  %v3083_v21 = vsub.s32 1, %v3077_v18  ;;  %v2614_v17 = vld [vmem:[#allocation13 + $0x3a4] ss:$16 sps:$4 sm:$0xff]  }
  0x7f   :  { %762 = vmatprep.subr.bf16.mxu0 %v2482_v34 }
  0x80   :  { %724 = vmatpush1.bf16.msra.mxu1 %v2483_v35  ;;  %v152_v22 = vrot.slane %v147_v20, %v3080_v19  ;;  %v156_v23 = vrot.slane %v147_v20, %v3083_v21  ;;  %v2609_v20 = vld [vmem:[#allocation13 + $0x1a0] ss:$16 sps:$4 sm:$0xff]  }
  0x81   :  { %725 = vmatprep.subr.bf16.mxu1 %v2491_v36  ;;  %v2549_v36 = vld [vmem:[#allocation13 + $0xe0] ss:$16 sps:$4 sm:$0xff]  }
  0x82   :  { %763 = vmatpush1.bf16.msra.mxu0 %v2480_v37  ;;  %v2552_v37 = vld [vmem:[#allocation13 + $0x2e0] ss:$16 sps:$4 sm:$0xff]  }
  0x83   :  { %764 = vmatprep.subr.bf16.mxu0 %v2488_v38 }
  0x84   :  { %726 = vmatpush1.bf16.msra.mxu1 %v2489_v39 }
  0x85   :  { %727 = vmatprep.subr.bf16.mxu1 %v2497_v40 }
  0x86   :  { %765 = vmatpush1.bf16.msra.mxu0 %v2486_v41  ;;  %v2557_v41 = vld [vmem:[#allocation13 + $0xc4] ss:$16 sps:$4 sm:$0xff]  }
  0x87   :  { %766 = vmatprep.subr.bf16.mxu0 %v2494_v42  ;;  %v2560_v42 = vld [vmem:[#allocation13 + $0x2c4] ss:$16 sps:$4 sm:$0xff]  }
  0x88   :  { %728 = vmatpush1.bf16.msra.mxu1 %v2495_v43 }
  0x89   :  { %729 = vmatprep.subr.bf16.mxu1 %v2503_v44  ;;  %v2555_v44 = vld [vmem:[#allocation13 + $0xc0] ss:$16 sps:$4 sm:$0xff]  }
  0x8a   :  { %767 = vmatpush1.bf16.msra.mxu0 %v2492_v45  ;;  %v2558_v45 = vld [vmem:[#allocation13 + $0x2c0] ss:$16 sps:$4 sm:$0xff]  }
  0x8b   :  { %768 = vmatprep.subr.bf16.mxu0 %v2500_v46 }
  0x8c   :  { %730 = vmatpush2.bf16.msra.mxu1 %v2501_v47  ;;  %v2563_v47 = vld [vmem:[#allocation13 + $0xa4] ss:$16 sps:$4 sm:$0xff]  }
  0x8d   :  { %731 = vmatprep.subr.bf16.mxu1 %v2509_v49 }
  0x8e   :  { %769 = vmatpush1.bf16.msra.mxu0 %v2498_v48  ;;  %v2566_v48 = vld [vmem:[#allocation13 + $0x2a4] ss:$16 sps:$4 sm:$0xff]  }
  0x8f   :  { %770 = vmatprep.subr.bf16.mxu0 %v2506_v50  ;;  %v2561_v50 = vld [vmem:[#allocation13 + $0xa0] ss:$16 sps:$4 sm:$0xff]  }
  0x90   :  { %732 = vmatpush2.bf16.msra.mxu1 %v2507_v51  ;;  %v2564_v51 = vld [vmem:[#allocation13 + $0x2a0] ss:$16 sps:$4 sm:$0xff]  }
  0x91   :  { %733 = vmatprep.subr.bf16.mxu1 %v2515_v52  ;;  %v2569_v52 = vld [vmem:[#allocation13 + $0x84] ss:$16 sps:$4 sm:$0xff]  }
  0x92   :  { %771 = vmatpush2.bf16.msra.mxu0 %v2504_v53  ;;  %v2572_v53 = vld [vmem:[#allocation13 + $0x284] ss:$16 sps:$4 sm:$0xff]  }
  0x93   :  { %772 = vmatprep.subr.bf16.mxu0 %v2512_v54  ;;  %v2567_v54 = vld [vmem:[#allocation13 + $0x80] ss:$16 sps:$4 sm:$0xff]  }
  0x94   :  { %734 = vmatpush2.bf16.msra.mxu1 %v2513_v55  ;;  %v2570_v55 = vld [vmem:[#allocation13 + $0x280] ss:$16 sps:$4 sm:$0xff]  }
  0x95   :  { %735 = vmatprep.subr.bf16.mxu1 %v2521_v56  ;;  %v2575_v56 = vld [vmem:[#allocation13 + $0x64] ss:$16 sps:$4 sm:$0xff]  }
  0x96   :  { %773 = vmatpush2.bf16.msra.mxu0 %v2510_v57  ;;  %v2578_v57 = vld [vmem:[#allocation13 + $0x264] ss:$16 sps:$4 sm:$0xff]  }
  0x97   :  { %774 = vmatprep.subr.bf16.mxu0 %v2518_v58  ;;  %v2573_v58 = vld [vmem:[#allocation13 + $0x60] ss:$16 sps:$4 sm:$0xff]  }
  0x98   :  { %736 = vmatpush2.bf16.msra.mxu1 %v2519_v59  ;;  %v2576_v59 = vld [vmem:[#allocation13 + $0x260] ss:$16 sps:$4 sm:$0xff]  }
  0x99   :  { %737 = vmatprep.subr.bf16.mxu1 %v2527_v60  ;;  %v2581_v60 = vld [vmem:[#allocation13 + $0x44] ss:$16 sps:$4 sm:$0xff]  }
  0x9a   :  { %775 = vmatpush2.bf16.msra.mxu0 %v2516_v61  ;;  %v2584_v61 = vld [vmem:[#allocation13 + $0x244] ss:$16 sps:$4 sm:$0xff]  }
  0x9b   :  { %776 = vmatprep.subr.bf16.mxu0 %v2524_v62  ;;  %v2579_v62 = vld [vmem:[#allocation13 + $0x40] ss:$16 sps:$4 sm:$0xff]  }
  0x9c   :  { %738 = vmatpush2.bf16.msra.mxu1 %v2525_v63  ;;  %v2582_v63 = vld [vmem:[#allocation13 + $0x240] ss:$16 sps:$4 sm:$0xff]  }
  0x9d   :  { %739 = vmatprep.subr.bf16.mxu1 %v2533_v0  ;;  %v2587_v0 = vld [vmem:[#allocation13 + $0x24] ss:$16 sps:$4 sm:$0xff]  }
  0x9e   :  { %777 = vmatpush2.bf16.msra.mxu0 %v2522_v1  ;;  %v2590_v1 = vld [vmem:[#allocation13 + $0x224] ss:$16 sps:$4 sm:$0xff]  }
  0x9f   :  { %778 = vmatprep.subr.bf16.mxu0 %v2530_v2  ;;  %v2585_v2 = vld [vmem:[#allocation13 + $0x20] ss:$16 sps:$4 sm:$0xff]  }
  0xa0   :  { %740 = vmatpush2.bf16.msra.mxu1 %v2531_v3  ;;  %v2588_v3 = vld [vmem:[#allocation13 + $0x220] ss:$16 sps:$4 sm:$0xff]  }
  0xa1   :  { %741 = vmatprep.subr.bf16.mxu1 %v2539_v7  ;;  %v2594_v7 = vld [vmem:[#allocation13 + $0x200] ss:$16 sps:$4 sm:$0xff]  }
  0xa2   :  { %779 = vmatpush2.bf16.msra.mxu0 %v2528_v4  ;;  %v2593_v4 = vld [vmem:[#allocation13 + $0x4] ss:$16 sps:$4 sm:$0xff]  }
  0xa3   :  { %780 = vmatprep.subr.bf16.mxu0 %v2536_v5  ;;  %v2596_v5 = vld [vmem:[#allocation13 + $0x204] ss:$16 sps:$4 sm:$0xff]  }
  0xa4   :  { %742 = vmatpush2.bf16.msra.mxu1 %v2537_v9  ;;  %v2602_v9 = vld [vmem:[#allocation13 + $0x3e4] ss:$16 sps:$4 sm:$0xff]  }
  0xa5   :  { %743 = vmatprep.subr.bf16.mxu1 %v2545_v11  ;;  %v2600_v11 = vld [vmem:[#allocation13 + $0x3e0] ss:$16 sps:$4 sm:$0xff]  }
  0xa6   :  { %781 = vmatpush2.bf16.msra.mxu0 %v2534_v6  ;;  %v2591_v6 = vld [vmem:[#allocation13] ss:$16 sps:$4 sm:$0xff]  }
  0xa7   :  { %782 = vmatprep.subr.bf16.mxu0 %v2542_v8  ;;  %v2599_v8 = vld [vmem:[#allocation13 + $0x1e4] ss:$16 sps:$4 sm:$0xff]  }
  0xa8   :  { %744 = vmatpush2.bf16.msra.mxu1 %v2543_v13  ;;  %v2608_v13 = vld [vmem:[#allocation13 + $0x3c4] ss:$16 sps:$4 sm:$0xff]  }
  0xa9   :  { %1615 = vmatprep.subr.bf16.mxu1 %v2551_v15  ;;  %v2606_v15 = vld [vmem:[#allocation13 + $0x3c0] ss:$16 sps:$4 sm:$0xff]  }
  0xaa   :  { %783 = vmatpush2.bf16.msra.mxu0 %v2540_v10  ;;  %v2597_v10 = vld [vmem:[#allocation13 + $0x1e0] ss:$16 sps:$4 sm:$0xff]  }
  0xab   :  { %784 = vmatprep.subr.bf16.mxu0 %v2548_v12  ;;  %v2605_v12 = vld [vmem:[#allocation13 + $0x1c4] ss:$16 sps:$4 sm:$0xff]  }
  0xae   :  { %785 = vmatpush2.bf16.msra.mxu0 %v2546_v14  ;;  %v2603_v14 = vld [vmem:[#allocation13 + $0x1c0] ss:$16 sps:$4 sm:$0xff]  }
  0xaf   :  { %1656 = vmatprep.subr.bf16.mxu0 %v2554_v16  ;;  %v2611_v16 = vld [vmem:[#allocation13 + $0x1a4] ss:$16 sps:$4 sm:$0xff]  }
 0x129   :  { %v207_v24 = vpop.f32.mrf.mxu0 }
 0x12a   :  { %v208_v25 = vadd.f32 %v207_v24, %v152_v22  ;;  %v2612_v22 = vld [vmem:[#allocation13 + $0x3a0] ss:$16 sps:$4 sm:$0xff]   ;;  %v2620_v24 = vld [vmem:[#allocation13 + $0x384] ss:$16 sps:$4 sm:$0xff]  }
 0x12b   :  { %v209_v26 = vpop.f32.mrf.mxu0  ;;  %v3087_v27 = vpop.f32.mrf.mxu1 }
 0x12c   :  { %v210_v28 = vadd.f32 %v209_v26, %v156_v23  ;;  %v214_v29 = vmax.f32 %v208_v25, 0.0  ;;  %v2617_v23 = vld [vmem:[#allocation13 + $0x184] ss:$16 sps:$4 sm:$0xff]   ;;  %v2615_v25 = vld [vmem:[#allocation13 + $0x180] ss:$16 sps:$4 sm:$0xff]  }
 0x12d   :  { %v211_v30 = vpop.f32.mrf.mxu0  ;;  %v3089_v31 = vpop.f32.mrf.mxu1  ;;  %v2618_v26 = vld [vmem:[#allocation13 + $0x380] ss:$16 sps:$4 sm:$0xff]  }
 0x12e   :  { %v215_v32 = vmax.f32 %v210_v28, 0.0  ;;  %v216_v38 = vpack.c.bf16 %v214_v29, %v214_v29  ;;  %v2623_v28 = vld [vmem:[#allocation13 + $0x164] ss:$16 sps:$4 sm:$0xff]   ;;  %v2621_v30 = vld [vmem:[#allocation13 + $0x160] ss:$16 sps:$4 sm:$0xff]  }
 0x12f   :  { %v212_v33 = vpop.f32.mrf.mxu0  ;;  %v349_v34 = vpop.f32.mrf.mxu1  ;;  %v2626_v29 = vld [vmem:[#allocation13 + $0x364] ss:$16 sps:$4 sm:$0xff]  }
 0x130   :  { %v217_v35 = vpack.c.bf16 %v215_v32, %v215_v32  ;;  %v2624_v32 = vld [vmem:[#allocation13 + $0x360] ss:$16 sps:$4 sm:$0xff]   ;;  %v2629_v33 = vld [vmem:[#allocation13 + $0x144] ss:$16 sps:$4 sm:$0xff]  }
 0x131   :  { %v3091_v39 = vpop.f32.mrf.mxu0  ;;  %v350_v40 = vpop.f32.mrf.mxu1  ;;  %v2632_v34 = vld [vmem:[#allocation13 + $0x344] ss:$16 sps:$4 sm:$0xff]  }
 0x132   :  { %745 = vmatprep.mubr.bf16.mxu1 %v217_v35  ;;  %786 = vmatprep.mubr.bf16.mxu0 %v217_v35  ;;  %v2627_v35 = vld [vmem:[#allocation13 + $0x140] ss:$16 sps:$4 sm:$0xff]  }
 0x133   :  { %746 = vmatmul.mubr.bf16.vlgmr.msra.gmra.mxu1 %v216_v38  ;;  %787 = vmatmul.mubr.bf16.vlgmr.msra.gmra.mxu0 %v216_v38  ;;  %v3093_v43 = vpop.f32.mrf.mxu0  ;;  %v2638_v38 = vld [vmem:[#allocation13 + $0x324] ss:$16 sps:$4 sm:$0xff]   ;;  %v2633_v40 = vld [vmem:[#allocation13 + $0x120] ss:$16 sps:$4 sm:$0xff]  }
 0x134   :  { %1616 = vmatpush1.bf16.msra.mxu1 %v2549_v36  ;;  %1657 = vmatpush1.bf16.msra.mxu0 %v2552_v37  ;;  %v2630_v36 = vld [vmem:[#allocation13 + $0x340] ss:$16 sps:$4 sm:$0xff]   ;;  %v2635_v37 = vld [vmem:[#allocation13 + $0x124] ss:$16 sps:$4 sm:$0xff]  }
 0x135   :  { %v390_v46 = vpop.f32.mrf.mxu0  ;;  %1617 = vmatprep.subr.bf16.mxu1 %v2557_v41  ;;  %1658 = vmatprep.subr.bf16.mxu0 %v2560_v42  ;;  %v2636_v41 = vld [vmem:[#allocation13 + $0x320] ss:$16 sps:$4 sm:$0xff]   ;;  %v2641_v42 = vld [vmem:[#allocation13 + $0x104] ss:$16 sps:$4 sm:$0xff]  }
 0x136   :  { %v2642_v46 = vld [vmem:[#allocation13 + $0x300] ss:$16 sps:$4 sm:$0xff]  }
 0x137   :  { %v391_v49 = vpop.f32.mrf.mxu0 }
 0x138   :  { %1618 = vmatpush1.bf16.msra.mxu1 %v2555_v44  ;;  %1659 = vmatpush1.bf16.msra.mxu0 %v2558_v45  ;;  %v2644_v44 = vld [vmem:[#allocation13 + $0x304] ss:$16 sps:$4 sm:$0xff]   ;;  %v2639_v45 = vld [vmem:[#allocation13 + $0x100] ss:$16 sps:$4 sm:$0xff]   ;;  %v807_v49 = vsub.s32 2, %v3077_v18 }
 0x139   :  { %1619 = vmatprep.subr.bf16.mxu1 %v2563_v47  ;;  %1660 = vmatprep.subr.bf16.mxu0 %v2566_v48  ;;  %v2647_v47 = vld [vmem:[#allocation13 + $0xec] ss:$16 sps:$4 sm:$0xff]  }
 0x13a   :  { %v2650_v48 = vld [vmem:[#allocation13 + $0x2ec] ss:$16 sps:$4 sm:$0xff]  }
 0x13c   :  { %1620 = vmatpush1.bf16.msra.mxu1 %v2561_v50  ;;  %1661 = vmatpush1.bf16.msra.mxu0 %v2564_v51  ;;  %v795_v50 = vld [vmem:[%s3139_s6] sm:$0xf]  ;;  %v811_v51 = vsub.s32 3, %v3077_v18 }
 0x13d   :  { %1621 = vmatprep.subr.bf16.mxu1 %v2569_v52  ;;  %1662 = vmatprep.subr.bf16.mxu0 %v2572_v53  ;;  %v800_v53 = vrot.slane %v795_v50, %v3080_v19 }
 0x140   :  { %1622 = vmatpush1.bf16.msra.mxu1 %v2567_v54  ;;  %1663 = vmatpush1.bf16.msra.mxu0 %v2570_v55  ;;  %v808_v55 = vrot.slane %v795_v50, %v807_v49 }
 0x141   :  { %1623 = vmatprep.subr.bf16.mxu1 %v2575_v56  ;;  %1664 = vmatprep.subr.bf16.mxu0 %v2578_v57 }
 0x144   :  { %1624 = vmatpush1.bf16.msra.mxu1 %v2573_v58  ;;  %1665 = vmatpush1.bf16.msra.mxu0 %v2576_v59  ;;  %v804_v58 = vrot.slane %v795_v50, %v3083_v21  ;;  %v812_v59 = vrot.slane %v795_v50, %v811_v51  ;;  %v2701_v50 = vld [vmem:[#allocation13 + $0x1cc] ss:$16 sps:$4 sm:$0xff]  }
 0x145   :  { %1625 = vmatprep.subr.bf16.mxu1 %v2581_v60  ;;  %1666 = vmatprep.subr.bf16.mxu0 %v2584_v61 }
 0x148   :  { %1626 = vmatpush1.bf16.msra.mxu1 %v2579_v62  ;;  %1667 = vmatpush1.bf16.msra.mxu0 %v2582_v63 }
 0x149   :  { %1627 = vmatprep.subr.bf16.mxu1 %v2587_v0  ;;  %1668 = vmatprep.subr.bf16.mxu0 %v2590_v1 }
 0x14c   :  { %1628 = vmatpush1.bf16.msra.mxu1 %v2585_v2  ;;  %1669 = vmatpush1.bf16.msra.mxu0 %v2588_v3 }
 0x14d   :  { %1629 = vmatprep.subr.bf16.mxu1 %v2593_v4  ;;  %1670 = vmatprep.subr.bf16.mxu0 %v2596_v5 }
 0x150   :  { %1630 = vmatpush1.bf16.msra.mxu1 %v2591_v6  ;;  %1671 = vmatpush1.bf16.msra.mxu0 %v2594_v7 }
 0x151   :  { %1631 = vmatprep.subr.bf16.mxu1 %v2599_v8  ;;  %1672 = vmatprep.subr.bf16.mxu0 %v2602_v9  ;;  %v2645_v8 = vld [vmem:[#allocation13 + $0xe8] ss:$16 sps:$4 sm:$0xff]  }
 0x152   :  { %v2648_v9 = vld [vmem:[#allocation13 + $0x2e8] ss:$16 sps:$4 sm:$0xff]  }
 0x154   :  { %1632 = vmatpush2.bf16.msra.mxu1 %v2597_v10  ;;  %1673 = vmatpush2.bf16.msra.mxu0 %v2600_v11 }
 0x155   :  { %1633 = vmatprep.subr.bf16.mxu1 %v2605_v12  ;;  %1674 = vmatprep.subr.bf16.mxu0 %v2608_v13  ;;  %v2651_v12 = vld [vmem:[#allocation13 + $0xc8] ss:$16 sps:$4 sm:$0xff]  }
 0x156   :  { %v2654_v13 = vld [vmem:[#allocation13 + $0x2c8] ss:$16 sps:$4 sm:$0xff]  }
 0x158   :  { %1634 = vmatpush2.bf16.msra.mxu1 %v2603_v14  ;;  %1675 = vmatpush2.bf16.msra.mxu0 %v2606_v15  ;;  %v2659_v14 = vld [vmem:[#allocation13 + $0xac] ss:$16 sps:$4 sm:$0xff]  }
 0x159   :  { %1635 = vmatprep.subr.bf16.mxu1 %v2611_v16  ;;  %1676 = vmatprep.subr.bf16.mxu0 %v2614_v17  ;;  %v2662_v15 = vld [vmem:[#allocation13 + $0x2ac] ss:$16 sps:$4 sm:$0xff]   ;;  %v2657_v16 = vld [vmem:[#allocation13 + $0xa8] ss:$16 sps:$4 sm:$0xff]  }
 0x15a   :  { %v2660_v17 = vld [vmem:[#allocation13 + $0x2a8] ss:$16 sps:$4 sm:$0xff]  }
 0x15c   :  { %1636 = vmatpush2.bf16.msra.mxu1 %v2609_v20  ;;  %1677 = vmatpush2.bf16.msra.mxu0 %v2612_v22  ;;  %v2665_v20 = vld [vmem:[#allocation13 + $0x8c] ss:$16 sps:$4 sm:$0xff]  }
 0x15d   :  { %1637 = vmatprep.subr.bf16.mxu1 %v2617_v23  ;;  %1678 = vmatprep.subr.bf16.mxu0 %v2620_v24  ;;  %v2668_v22 = vld [vmem:[#allocation13 + $0x28c] ss:$16 sps:$4 sm:$0xff]   ;;  %v2663_v23 = vld [vmem:[#allocation13 + $0x88] ss:$16 sps:$4 sm:$0xff]  }
 0x15e   :  { %v2666_v24 = vld [vmem:[#allocation13 + $0x288] ss:$16 sps:$4 sm:$0xff]  }
 0x160   :  { %1638 = vmatpush2.bf16.msra.mxu1 %v2615_v25  ;;  %1679 = vmatpush2.bf16.msra.mxu0 %v2618_v26  ;;  %v2671_v25 = vld [vmem:[#allocation13 + $0x6c] ss:$16 sps:$4 sm:$0xff]  }
 0x161   :  { %1639 = vmatprep.subr.bf16.mxu1 %v2623_v28  ;;  %1680 = vmatprep.subr.bf16.mxu0 %v2626_v29  ;;  %v2674_v26 = vld [vmem:[#allocation13 + $0x26c] ss:$16 sps:$4 sm:$0xff]   ;;  %v2669_v28 = vld [vmem:[#allocation13 + $0x68] ss:$16 sps:$4 sm:$0xff]  }
 0x162   :  { %v2672_v29 = vld [vmem:[#allocation13 + $0x268] ss:$16 sps:$4 sm:$0xff]  }
 0x164   :  { %1640 = vmatpush2.bf16.msra.mxu1 %v2621_v30  ;;  %1681 = vmatpush2.bf16.msra.mxu0 %v2624_v32  ;;  %v2677_v30 = vld [vmem:[#allocation13 + $0x4c] ss:$16 sps:$4 sm:$0xff]  }
 0x165   :  { %1641 = vmatprep.subr.bf16.mxu1 %v2629_v33  ;;  %1682 = vmatprep.subr.bf16.mxu0 %v2632_v34  ;;  %v2680_v32 = vld [vmem:[#allocation13 + $0x24c] ss:$16 sps:$4 sm:$0xff]   ;;  %v2675_v33 = vld [vmem:[#allocation13 + $0x48] ss:$16 sps:$4 sm:$0xff]  }
 0x166   :  { %v2678_v34 = vld [vmem:[#allocation13 + $0x248] ss:$16 sps:$4 sm:$0xff]  }
 0x168   :  { %1642 = vmatpush2.bf16.msra.mxu1 %v2627_v35  ;;  %1683 = vmatpush2.bf16.msra.mxu0 %v2630_v36  ;;  %v2683_v35 = vld [vmem:[#allocation13 + $0x2c] ss:$16 sps:$4 sm:$0xff]  }
 0x169   :  { %1643 = vmatprep.subr.bf16.mxu1 %v2635_v37  ;;  %1684 = vmatprep.subr.bf16.mxu0 %v2638_v38  ;;  %v2686_v36 = vld [vmem:[#allocation13 + $0x22c] ss:$16 sps:$4 sm:$0xff]   ;;  %v2681_v37 = vld [vmem:[#allocation13 + $0x28] ss:$16 sps:$4 sm:$0xff]  }
 0x16a   :  { %v2684_v38 = vld [vmem:[#allocation13 + $0x228] ss:$16 sps:$4 sm:$0xff]  }
 0x16c   :  { %1644 = vmatpush2.bf16.msra.mxu1 %v2633_v40  ;;  %1685 = vmatpush2.bf16.msra.mxu0 %v2636_v41  ;;  %v2689_v40 = vld [vmem:[#allocation13 + $0xc] ss:$16 sps:$4 sm:$0xff]  }
 0x16d   :  { %1645 = vmatprep.subr.bf16.mxu1 %v2641_v42  ;;  %1686 = vmatprep.subr.bf16.mxu0 %v2644_v44  ;;  %v2692_v41 = vld [vmem:[#allocation13 + $0x20c] ss:$16 sps:$4 sm:$0xff]   ;;  %v2687_v42 = vld [vmem:[#allocation13 + $0x8] ss:$16 sps:$4 sm:$0xff]  }
 0x16e   :  { %v2690_v44 = vld [vmem:[#allocation13 + $0x208] ss:$16 sps:$4 sm:$0xff]  }
 0x170   :  { %1646 = vmatpush2.bf16.msra.mxu1 %v2639_v45  ;;  %1687 = vmatpush2.bf16.msra.mxu0 %v2642_v46  ;;  %v2695_v45 = vld [vmem:[#allocation13 + $0x1ec] ss:$16 sps:$4 sm:$0xff]  }
 0x171   :  { %1697 = vmatprep.subr.bf16.mxu1 %v2647_v47  ;;  %1738 = vmatprep.subr.bf16.mxu0 %v2650_v48  ;;  %v2698_v46 = vld [vmem:[#allocation13 + $0x3ec] ss:$16 sps:$4 sm:$0xff]   ;;  %v2693_v47 = vld [vmem:[#allocation13 + $0x1e8] ss:$16 sps:$4 sm:$0xff]  }
 0x172   :  { %v2696_v48 = vld [vmem:[#allocation13 + $0x3e8] ss:$16 sps:$4 sm:$0xff]  }
 0x1f3   :  { %v747_v52 = vpop.f32.mrf.mxu1  ;;  %v788_v54 = vpop.f32.mrf.mxu0 }
 0x1f4   :  { %v748_v56 = vadd.f32 %v747_v52, %v3087_v27  ;;  %v789_v57 = vadd.f32 %v788_v54, %v3091_v39  ;;  %v2704_v52 = vld [vmem:[#allocation13 + $0x3cc] ss:$16 sps:$4 sm:$0xff]   ;;  %v2702_v54 = vld [vmem:[#allocation13 + $0x3c8] ss:$16 sps:$4 sm:$0xff]  }
 0x1f5   :  { %v749_v60 = vpop.f32.mrf.mxu1  ;;  %v790_v61 = vpop.f32.mrf.mxu0 }
 0x1f6   :  { %v750_v62 = vadd.f32 %v749_v60, %v3089_v31  ;;  %v791_v63 = vadd.f32 %v790_v61, %v3093_v43  ;;  %v817_v0 = vadd.f32 %v800_v53, %v748_v56  ;;  %v819_v1 = vadd.f32 %v808_v55, %v789_v57  ;;  %v2653_v31 = vld [vmem:[#allocation13 + $0xcc] ss:$16 sps:$4 sm:$0xff]   ;;  %v2699_v53 = vld [vmem:[#allocation13 + $0x1c8] ss:$16 sps:$4 sm:$0xff]  }
 0x1f7   :  { %v751_v2 = vpop.f32.mrf.mxu1  ;;  %v792_v3 = vpop.f32.mrf.mxu0  ;;  %v2656_v43 = vld [vmem:[#allocation13 + $0x2cc] ss:$16 sps:$4 sm:$0xff]   ;;  %v2705_v57 = vld [vmem:[#allocation13 + $0x1a8] ss:$16 sps:$4 sm:$0xff]  }
 0x1f8   :  { %v818_v4 = vadd.f32 %v804_v58, %v750_v62  ;;  %v820_v5 = vadd.f32 %v812_v59, %v791_v63  ;;  %v3110_v10 = vpack.c.bf16 %v817_v0, %v817_v0  ;;  %v3112_v11 = vpack.c.bf16 %v819_v1, %v819_v1  ;;  %v2707_v55 = vld [vmem:[#allocation13 + $0x1ac] ss:$16 sps:$4 sm:$0xff]   ;;  %v2708_v58 = vld [vmem:[#allocation13 + $0x3a8] ss:$16 sps:$4 sm:$0xff]  }
 0x1f9   :  { %v752_v27 = vpop.f32.mrf.mxu1  ;;  %v793_v6 = vpop.f32.mrf.mxu0  ;;  %v2710_v56 = vld [vmem:[#allocation13 + $0x3ac] ss:$16 sps:$4 sm:$0xff]   ;;  %v2711_v61 = vld [vmem:[#allocation13 + $0x188] ss:$16 sps:$4 sm:$0xff]  }
 0x1fa   :  { %v822_v39 = vpack.c.bf16 %v818_v4, %v818_v4  ;;  %v824_v7 = vpack.c.bf16 %v820_v5, %v820_v5  ;;  %v2713_v59 = vld [vmem:[#allocation13 + $0x18c] ss:$16 sps:$4 sm:$0xff]   ;;  %v2714_v62 = vld [vmem:[#allocation13 + $0x388] ss:$16 sps:$4 sm:$0xff]  }
 0x1fb   :  { %v2716_v60 = vld [vmem:[#allocation13 + $0x38c] ss:$16 sps:$4 sm:$0xff]   ;;  %v2717_v1 = vld [vmem:[#allocation13 + $0x168] ss:$16 sps:$4 sm:$0xff]  }
 0x1fc   :  { %1647 = vmatprep.mubr.bf16.mxu1 %v822_v39  ;;  %1688 = vmatprep.mubr.bf16.mxu0 %v824_v7  ;;  %v2719_v63 = vld [vmem:[#allocation13 + $0x16c] ss:$16 sps:$4 sm:$0xff]   ;;  %v2720_v2 = vld [vmem:[#allocation13 + $0x368] ss:$16 sps:$4 sm:$0xff]  }
 0x1fd   :  { %1648 = vmatmul.mubr.bf16.vlgmr.msra.gmra.mxu1 %v3110_v10  ;;  %1689 = vmatmul.mubr.bf16.vlgmr.msra.gmra.mxu0 %v3112_v11  ;;  %v2722_v0 = vld [vmem:[#allocation13 + $0x36c] ss:$16 sps:$4 sm:$0xff]   ;;  %v2723_v5 = vld [vmem:[#allocation13 + $0x148] ss:$16 sps:$4 sm:$0xff]  }
 0x1fe   :  { %1698 = vmatpush1.bf16.msra.mxu1 %v2645_v8  ;;  %1739 = vmatpush1.bf16.msra.mxu0 %v2648_v9  ;;  %v2725_v3 = vld [vmem:[#allocation13 + $0x14c] ss:$16 sps:$4 sm:$0xff]   ;;  %v2726_v27 = vld [vmem:[#allocation13 + $0x348] ss:$16 sps:$4 sm:$0xff]  }
 0x1ff   :  { %1729 = vmatprep.mubr.bf16.mxu1 %v822_v39  ;;  %1770 = vmatprep.mubr.bf16.mxu0 %v824_v7  ;;  %v2728_v4 = vld [vmem:[#allocation13 + $0x34c] ss:$16 sps:$4 sm:$0xff]   ;;  %v2729_v7 = vld [vmem:[#allocation13 + $0x128] ss:$16 sps:$4 sm:$0xff]  }
 0x200   :  { %1699 = vmatprep.subr.bf16.mxu1 %v2653_v31  ;;  %1740 = vmatprep.subr.bf16.mxu0 %v2656_v43  ;;  %v2731_v6 = vld [vmem:[#allocation13 + $0x12c] ss:$16 sps:$4 sm:$0xff]   ;;  %v2732_v8 = vld [vmem:[#allocation13 + $0x328] ss:$16 sps:$4 sm:$0xff]  }
 0x201   :  { %v2734_v39 = vld [vmem:[#allocation13 + $0x32c] ss:$16 sps:$4 sm:$0xff]   ;;  %v2735_v43 = vld [vmem:[#allocation13 + $0x108] ss:$16 sps:$4 sm:$0xff]  }
 0x202   :  { %1700 = vmatpush1.bf16.msra.mxu1 %v2651_v12  ;;  %1741 = vmatpush1.bf16.msra.mxu0 %v2654_v13  ;;  %v2737_v9 = vld [vmem:[#allocation13 + $0x10c] ss:$16 sps:$4 sm:$0xff]   ;;  %v2738_v12 = vld [vmem:[#allocation13 + $0x308] ss:$16 sps:$4 sm:$0xff]  }
 0x203   :  { %1701 = vmatprep.subr.bf16.mxu1 %v2659_v14  ;;  %1742 = vmatprep.subr.bf16.mxu0 %v2662_v15  ;;  %v2740_v31 = vld [vmem:[#allocation13 + $0x30c] ss:$16 sps:$4 sm:$0xff]   ;;  %v2743_v15 = vld [vmem:[#allocation14 + $0x70] sm:$0xff]  }
 0x204   :  { %v2741_v13 = vld [vmem:[#allocation14 + $0x78] sm:$0xff]  }
 0x205   :  { %v2742_v14 = vld [vmem:[#allocation14 + $0x38] sm:$0xff]  }
 0x206   :  { %1702 = vmatpush1.bf16.msra.mxu1 %v2657_v16  ;;  %1743 = vmatpush1.bf16.msra.mxu0 %v2660_v17  ;;  %v2744_v16 = vld [vmem:[#allocation14 + $0x30] sm:$0xff]   ;;  %v2745_v17 = vld [vmem:[#allocation14 + $0x68] sm:$0xff]  }
 0x207   :  { %1703 = vmatprep.subr.bf16.mxu1 %v2665_v20  ;;  %1744 = vmatprep.subr.bf16.mxu0 %v2668_v22  ;;  %v2746_v20 = vld [vmem:[#allocation14 + $0x28] sm:$0xff]   ;;  %v2747_v22 = vld [vmem:[#allocation14 + $0x60] sm:$0xff]  }
 0x20a   :  { %1704 = vmatpush1.bf16.msra.mxu1 %v2663_v23  ;;  %1745 = vmatpush1.bf16.msra.mxu0 %v2666_v24  ;;  %v2748_v23 = vld [vmem:[#allocation14 + $0x20] sm:$0xff]   ;;  %v2749_v24 = vld [vmem:[#allocation14 + $0x58] sm:$0xff]  }
 0x20b   :  { %1705 = vmatprep.subr.bf16.mxu1 %v2671_v25  ;;  %1746 = vmatprep.subr.bf16.mxu0 %v2674_v26  ;;  %v2757_v25 = vld [vmem:[#allocation14 + $0xf8] sm:$0xff]  }
 0x20c   :  { %v2758_v26 = vld [vmem:[#allocation14 + $0xb8] sm:$0xff]  }
 0x20e   :  { %1706 = vmatpush1.bf16.msra.mxu1 %v2669_v28  ;;  %1747 = vmatpush1.bf16.msra.mxu0 %v2672_v29  ;;  %v2759_v28 = vld [vmem:[#allocation14 + $0xf0] sm:$0xff]   ;;  %v2750_v29 = vld [vmem:[#allocation14 + $0x18] sm:$0xff]  }
 0x20f   :  { %1707 = vmatprep.subr.bf16.mxu1 %v2677_v30  ;;  %1748 = vmatprep.subr.bf16.mxu0 %v2680_v32  ;;  %v2761_v30 = vld [vmem:[#allocation14 + $0xe8] sm:$0xff]   ;;  %v2752_v32 = vld [vmem:[#allocation14 + $0x10] sm:$0xff]  }
 0x212   :  { %1708 = vmatpush1.bf16.msra.mxu1 %v2675_v33  ;;  %1749 = vmatpush1.bf16.msra.mxu0 %v2678_v34  ;;  %v2753_v33 = vld [vmem:[#allocation14 + $0x48] sm:$0xff]  }
 0x213   :  { %1709 = vmatprep.subr.bf16.mxu1 %v2683_v35  ;;  %1750 = vmatprep.subr.bf16.mxu0 %v2686_v36  ;;  %v2762_v34 = vld [vmem:[#allocation14 + $0xa8] sm:$0xff]   ;;  %v2763_v35 = vld [vmem:[#allocation14 + $0xe0] sm:$0xff]  }
 0x214   :  { %v2754_v36 = vld [vmem:[#allocation14 + $0x8] sm:$0xff]  }
 0x216   :  { %1710 = vmatpush1.bf16.msra.mxu1 %v2681_v37  ;;  %1751 = vmatpush1.bf16.msra.mxu0 %v2684_v38  ;;  %v2755_v37 = vld [vmem:[#allocation14 + $0x40] sm:$0xff]  }
 0x217   :  { %1711 = vmatprep.subr.bf16.mxu1 %v2689_v40  ;;  %1752 = vmatprep.subr.bf16.mxu0 %v2692_v41  ;;  %v2764_v38 = vld [vmem:[#allocation14 + $0xa0] sm:$0xff]   ;;  %v2765_v40 = vld [vmem:[#allocation14 + $0xd8] sm:$0xff]  }
 0x218   :  { %v2756_v41 = vld [vmem:[#allocation14] sm:$0xff]  }
 0x21a   :  { %1712 = vmatpush1.bf16.msra.mxu1 %v2687_v42  ;;  %1753 = vmatpush1.bf16.msra.mxu0 %v2690_v44  ;;  %v2766_v42 = vld [vmem:[#allocation14 + $0x98] sm:$0xff]   ;;  %v2767_v44 = vld [vmem:[#allocation14 + $0xd0] sm:$0xff]  }
 0x21b   :  { %1713 = vmatprep.subr.bf16.mxu1 %v2695_v45  ;;  %1754 = vmatprep.subr.bf16.mxu0 %v2698_v46  ;;  %v2768_v45 = vld [vmem:[#allocation14 + $0x90] sm:$0xff]   ;;  %v2769_v46 = vld [vmem:[#allocation14 + $0xc8] sm:$0xff]  }
 0x21e   :  { %1714 = vmatpush2.bf16.msra.mxu1 %v2693_v47  ;;  %1755 = vmatpush2.bf16.msra.mxu0 %v2696_v48  ;;  %v2770_v47 = vld [vmem:[#allocation14 + $0x88] sm:$0xff]   ;;  %v2771_v48 = vld [vmem:[#allocation14 + $0xc0] sm:$0xff]  }
 0x21f   :  { %1715 = vmatprep.subr.bf16.mxu1 %v2701_v50  ;;  %1756 = vmatprep.subr.bf16.mxu0 %v2704_v52  ;;  %v2772_v50 = vld [vmem:[#allocation14 + $0x80] sm:$0xff]   ;;  %v953_v52 = vld [vmem:[%s3141_s8] sm:$0xf] }
 0x222   :  { %1716 = vmatpush2.bf16.msra.mxu1 %v2699_v53  ;;  %1757 = vmatpush2.bf16.msra.mxu0 %v2702_v54  ;;  %v958_v53 = vrot.slane %v953_v52, %v3080_v19  ;;  %v962_v54 = vrot.slane %v953_v52, %v3083_v21  ;;  %v966_v19 = vrot.slane %v953_v52, %v807_v49 }
 0x223   :  { %1717 = vmatprep.subr.bf16.mxu1 %v2707_v55  ;;  %1758 = vmatprep.subr.bf16.mxu0 %v2710_v56  ;;  %v970_v21 = vrot.slane %v953_v52, %v811_v51 }
 0x226   :  { %1718 = vmatpush2.bf16.msra.mxu1 %v2705_v57  ;;  %1759 = vmatpush2.bf16.msra.mxu0 %v2708_v58 }
 0x227   :  { %1719 = vmatprep.subr.bf16.mxu1 %v2713_v59  ;;  %1760 = vmatprep.subr.bf16.mxu0 %v2716_v60 }
 0x22a   :  { %1720 = vmatpush2.bf16.msra.mxu1 %v2711_v61  ;;  %1761 = vmatpush2.bf16.msra.mxu0 %v2714_v62 }
 0x22b   :  { %1721 = vmatprep.subr.bf16.mxu1 %v2719_v63  ;;  %1762 = vmatprep.subr.bf16.mxu0 %v2722_v0 }
 0x22e   :  { %1722 = vmatpush2.bf16.msra.mxu1 %v2717_v1  ;;  %1763 = vmatpush2.bf16.msra.mxu0 %v2720_v2 }
 0x22f   :  { %1723 = vmatprep.subr.bf16.mxu1 %v2725_v3  ;;  %1764 = vmatprep.subr.bf16.mxu0 %v2728_v4 }
 0x232   :  { %1724 = vmatpush2.bf16.msra.mxu1 %v2723_v5  ;;  %1765 = vmatpush2.bf16.msra.mxu0 %v2726_v27 }
 0x233   :  { %1725 = vmatprep.subr.bf16.mxu1 %v2731_v6  ;;  %1766 = vmatprep.subr.bf16.mxu0 %v2734_v39 }
 0x236   :  { %1726 = vmatpush2.bf16.msra.mxu1 %v2729_v7  ;;  %1767 = vmatpush2.bf16.msra.mxu0 %v2732_v8 }
 0x237   :  { %1727 = vmatprep.subr.bf16.mxu1 %v2737_v9  ;;  %1768 = vmatprep.subr.bf16.mxu0 %v2740_v31 }
 0x23a   :  { %1728 = vmatpush2.bf16.msra.mxu1 %v2735_v43  ;;  %1769 = vmatpush2.bf16.msra.mxu0 %v2738_v12 }
 0x23b   :  { %2386 = vmatprep.subr.bf16.mxu1 %v2741_v13  ;;  %2408 = vmatprep.subr.bf16.mxu0 %v2757_v25 }
 0x23d   :  { %1730 = vmatmul.mubr.bf16.vlgmr.msra.gmra.mxu1 %v3110_v10  ;;  %1771 = vmatmul.mubr.bf16.vlgmr.msra.gmra.mxu0 %v3112_v11  ;;  %v2751_v10 = vld [vmem:[#allocation14 + $0x50] sm:$0xff]  }
 0x23e   :  { %2387 = vmatpush3.bf16.msra.mxu1 %v2742_v14  ;;  %2409 = vmatpush3.bf16.msra.mxu0 %v2758_v26  ;;  %v2760_v11 = vld [vmem:[#allocation14 + $0xb0] sm:$0xff]   ;;  %v2353_v26 = vld [vmem:[%s3143_s10] ss:$0 sm:$0xff] }
 0x23f   :  { %2388 = vmatprep.subr.bf16.mxu1 %v2743_v15  ;;  %2410 = vmatprep.subr.bf16.mxu0 %v2759_v28 }
 0x242   :  { %2389 = vmatpush3.bf16.msra.mxu1 %v2744_v16  ;;  %2411 = vmatpush3.bf16.msra.mxu0 %v2760_v11 }
 0x243   :  { %2390 = vmatprep.subr.bf16.mxu1 %v2745_v17  ;;  %2412 = vmatprep.subr.bf16.mxu0 %v2761_v30 }
 0x246   :  { %2391 = vmatpush3.bf16.msra.mxu1 %v2746_v20  ;;  %2413 = vmatpush3.bf16.msra.mxu0 %v2762_v34 }
 0x247   :  { %2392 = vmatprep.subr.bf16.mxu1 %v2747_v22  ;;  %2414 = vmatprep.subr.bf16.mxu0 %v2763_v35 }
 0x24a   :  { %2393 = vmatpush3.bf16.msra.mxu1 %v2748_v23  ;;  %2415 = vmatpush3.bf16.msra.mxu0 %v2764_v38 }
 0x24b   :  { %2394 = vmatprep.subr.bf16.mxu1 %v2749_v24  ;;  %2416 = vmatprep.subr.bf16.mxu0 %v2765_v40 }
 0x24e   :  { %2395 = vmatpush3.bf16.msra.mxu1 %v2750_v29  ;;  %2417 = vmatpush3.bf16.msra.mxu0 %v2766_v42 }
 0x24f   :  { %2396 = vmatprep.subr.bf16.mxu1 %v2751_v10  ;;  %2418 = vmatprep.subr.bf16.mxu0 %v2767_v44 }
 0x252   :  { %2397 = vmatpush3.bf16.msra.mxu1 %v2752_v32  ;;  %2419 = vmatpush3.bf16.msra.mxu0 %v2768_v45 }
 0x253   :  { %2398 = vmatprep.subr.bf16.mxu1 %v2753_v33  ;;  %2420 = vmatprep.subr.bf16.mxu0 %v2769_v46 }
 0x256   :  { %2399 = vmatpush3.bf16.msra.mxu1 %v2754_v36  ;;  %2421 = vmatpush3.bf16.msra.mxu0 %v2770_v47 }
 0x257   :  { %2400 = vmatprep.subr.bf16.mxu1 %v2755_v37  ;;  %2422 = vmatprep.subr.bf16.mxu0 %v2771_v48 }
 0x25a   :  { %2401 = vmatpush3.bf16.msra.mxu1 %v2756_v41  ;;  %2423 = vmatpush3.bf16.msra.mxu0 %v2772_v50 }
 0x2bd   :  { %v1649_v55 = vpop.f32.mrf.mxu1  ;;  %v1690_v56 = vpop.f32.mrf.mxu0 }
 0x2be   :  { %v1650_v57 = vadd.f32 %v1649_v55, %v958_v53 }
 0x2bf   :  { %v1651_v58 = vpop.f32.mrf.mxu1  ;;  %v1692_v59 = vpop.f32.mrf.mxu0 }
 0x2c0   :  { %v1691_v60 = vadd.f32 %v1690_v56, %v1650_v57  ;;  %v1652_v61 = vadd.f32 %v1651_v58, %v962_v54 }
 0x2c1   :  { %v1653_v62 = vpop.f32.mrf.mxu1  ;;  %v1694_v63 = vpop.f32.mrf.mxu0 }
 0x2c2   :  { %v1693_v0 = vadd.f32 %v1692_v59, %v1652_v61  ;;  %v1779_v1 = vmax.f32 %v1691_v60, 0.0 }
 0x2c3   :  { %v1654_v2 = vpop.f32.mrf.mxu1  ;;  %v1695_v3 = vpop.f32.mrf.mxu0 }
 0x2c4   :  { %v1780_v4 = vmax.f32 %v1693_v0, 0.0  ;;  %v1783_v27 = vpack.c.bf16 %v1779_v1, %v1779_v1 }
 0x2c6   :  { %v1784_v5 = vpack.c.bf16 %v1780_v4, %v1780_v4 }
 0x2c8   :  { %2082 = vmatprep.mubr.bf16.mxu1 %v1784_v5 }
 0x2c9   :  { %2083 = vmatmul.mubr.bf16.vlgmr.msra.gmra.mxu1 %v1783_v27 }
 0x2fd   :  { %v1731_v6 = vpop.f32.mrf.mxu1  ;;  %v1772_v39 = vpop.f32.mrf.mxu0 }
 0x2fe   :  { %v1732_v7 = vadd.f32 %v1731_v6, %v966_v19 }
 0x2ff   :  { %v1733_v8 = vpop.f32.mrf.mxu1  ;;  %v1774_v9 = vpop.f32.mrf.mxu0 }
 0x300   :  { %v1773_v31 = vadd.f32 %v1772_v39, %v1732_v7  ;;  %v1734_v43 = vadd.f32 %v1733_v8, %v970_v21 }
 0x301   :  { %v1735_v12 = vpop.f32.mrf.mxu1  ;;  %v1776_v13 = vpop.f32.mrf.mxu0 }
 0x302   :  { %v1775_v14 = vadd.f32 %v1774_v9, %v1734_v43  ;;  %v1781_v15 = vmax.f32 %v1773_v31, 0.0 }
 0x303   :  { %v1736_v16 = vpop.f32.mrf.mxu1  ;;  %v1777_v17 = vpop.f32.mrf.mxu0 }
 0x304   :  { %v1782_v20 = vmax.f32 %v1775_v14, 0.0  ;;  %v1785_v23 = vpack.c.bf16 %v1781_v15, %v1781_v15 }
 0x306   :  { %v1786_v22 = vpack.c.bf16 %v1782_v20, %v1782_v20 }
 0x308   :  { %2122 = vmatprep.mubr.bf16.mxu0 %v1786_v22 }
 0x309   :  { %2123 = vmatmul.mubr.bf16.vlgmr.msra.gmra.mxu0 %v1785_v23 }
 0x389   :  { %v2402_v18 = vpop.f32.mrf.mxu1 }
 0x38b   :  { %v2403_v49 = vpop.f32.mrf.mxu1 }
 0x38c   :  { %v2404_v25 = vadd.f32 %v2403_v49, %v2402_v18 }
 0x38d   :  { %v2405_v51 = vpop.f32.mrf.mxu1 }
 0x38e   :  { %v2085_v10 = vadd.f32 %v2404_v25, %v2353_v26 }
 0x38f   :  { %v2406_v24 = vpop.f32.mrf.mxu1 }
 0x3c9   :  { %v2424_v28 = vpop.f32.mrf.mxu0 }
 0x3cb   :  { %v2425_v29 = vpop.f32.mrf.mxu0 }
 0x3cc   :  { %v2426_v11 = vadd.f32 %v2425_v29, %v2424_v28 }
 0x3cd   :  { %v2427_v30 = vpop.f32.mrf.mxu0 }
 0x3ce   :  { %v2125_v32 = vadd.f32 %v2426_v11, %v2085_v10 }
 0x3cf   :  { %v2428_v33 = vpop.f32.mrf.mxu0 }
 0x3d0   :  { %2130 = vst [vmem:[#allocation16] sm:$0xff] %v2125_v32 }
 0x3d1   :  { %2944 = shalt.err (!%p2941_p2)
}
 0x3d2   :  { %2140 = dma.vmem_to_hbm [thread:$0]  %s2138_s20, 128, %s3144_s11, [#allocation4]  }
 0x3d3   :  { %2963 = dma.done.wait [#allocation4], 128  }
 0x3d4   :  { %2964 = vsyncadd [#allocation4], 4294967168 }
 0x3d5   :  { %2144 = vsyncpa [#allocation3], 1 }
 0x3d6   :  { %2145 = vsyncpa [#allocation6], 1 }
 0x3d7   :  { %2146 = vsyncpa [#allocation9], 1 }
 0x3d8   :  { %2147 = vsyncpa [#allocation12], 1 }
 0x3d9   :  { %2148 = vsyncpa [#allocation15], 1 }
 0x3da   :  { %2149 = vsyncpa [#allocation4], 1 }

</bundles_post_ra>
